<compile_context>
chip_gen: v6e
topology: v6e:2x2x1
jax: 0.10.0
libtpu: 0.0.40
codegen_flags: <defaults>
</compile_context>

<pallas_src>
import math
from functools import partial

import jax
import jax.numpy as jnp
from jax.experimental import pallas as pl
from jax.experimental.pallas import tpu as pltpu

D = 256            # d_model
NS = 64            # N_s
C = 2 * NS         # channel reals per sample (QPSK, bps=2 -> 128)
HID = 128          # hyper / bottleneck hidden width
K_MOD = 1          # len(M_list)
TB = 16            # rows per independent forward group (bf16 sublane-full)

_SQRT2 = math.sqrt(2.0)
_INV_LN2 = 1.0 / math.log(2.0)
_QPSK_SCALE = 1.0 / math.sqrt(7.0 / 3.0)   # map_to_constellation norm for M=4

# ---- packed-weight column layouts (all boundaries are multiples of 128) -------------
# wA: [256, 896]  bf16 -- operands whose contraction dim is d_model = 256
#     he_w1a and lb_w1 are adjacent so the two y-consumers fuse into one matmul.
_A = {"he_w1a": (0, 128), "lb_w1": (128, 256), "hd_w1": (256, 384),
      "ce_w": (384, 512), "dec_w1": (512, 768), "dec_w2": (768, 896)}
_A_ORDER = ["he_w1a", "lb_w1", "hd_w1", "ce_w", "dec_w1", "dec_w2"]
A_COLS = 896
# wB: [128, 1408] bf16 -- operands whose contraction dim is 128
_B = {"he_w2": (0, 256), "hd_w2": (256, 768), "lb_w2": (768, 896),
      "cd_w": (896, 1152), "dip_w": (1152, 1408)}
_B_ORDER = ["he_w2", "hd_w2", "lb_w2", "cd_w", "dip_w"]
B_COLS = 1408
# bias pack: [1, 2688] f32 (also carries the SNR row of hyper_encoder W1)
_BIAS_ORDER = [("proj_b", 256), ("he_b1", 128), ("he_b2", 256), ("hd_b1", 128),
               ("hd_b2", 512), ("lb_b1", 128), ("lb_b2", 128), ("dip_b", 256),
               ("ce_b", 128), ("cd_b", 256), ("dec_b1", 256), ("dec_b2", 128),
               ("he_w1b", 128)]
_BIAS = {}
_off = 0
for _name, _w in _BIAS_ORDER:
    _BIAS[_name] = (_off, _off + _w)
    _off += _w
BIAS_COLS = _off   # 2688


def _softplus(x):
    # torch.nn.functional.softplus (beta=1); shared by kernel & reference
    return jnp.maximum(x, 0.0) + jnp.log(1.0 + jnp.exp(-jnp.abs(x)))


def _sigmoid(x):
    return 1.0 / (1.0 + jnp.exp(-x))


def jscc_kernel(cls_ref, noise_ref, proj_w, wA, wB, bias, out_ref):
    f32, bf16 = jnp.float32, jnp.bfloat16
    rows = cls_ref.shape[0]

    def b_(name):
        lo, hi = _BIAS[name]
        return bias[:, lo:hi]

    def a_(name):
        lo, hi = _A[name]
        return wA[:, lo:hi]

    def w_(name):
        lo, hi = _B[name]
        return wB[:, lo:hi]

    def mm(x, w):
        # bf16 MXU operands, f32 accumulation
        return jnp.dot(x.astype(bf16), w, preferred_element_type=f32)

    # --- RoBERTaEncoder.projection (backbone CLS feature supplied by wrapper, bf16) ---
    y = mm(cls_ref[...], proj_w[...]) + b_("proj_b")            # [rows, 256]

    nv = noise_ref[:, 2 * C:3 * C]                              # [rows, 128] lane-broadcast n_var
    snr = -jnp.log(nv)                                          # == log(1 / n_var), per row

    # --- fused y-consumers: hyper_encoder W1 (d_model part) | latent_bottleneck W1 ---
    yz = mm(y, wA[:, 0:2 * HID])                                # [rows, 256]
    h1 = jnp.maximum(yz[:, :HID] + snr * b_("he_w1b") + b_("he_b1"), 0.0)
    yb = jnp.maximum(yz[:, HID:2 * HID] + b_("lb_b1"), 0.0)

    # --- hyper_encoder[2] -> quantize (eval) ---
    z = mm(h1, w_("he_w2")) + b_("he_b2")
    z_t = jnp.round(z)
    # TODO(synk): training-mode additive U(-0.5,0.5) quantization noise not implemented (eval only).

    # --- hyper_decoder: mu|sigma fused into one [128,512] matmul.
    #     mod_logits column dropped: K=1 -> eval gumbel_softmax over a singleton dim == 1. ---
    g1 = jnp.maximum(mm(z_t, a_("hd_w1")) + b_("hd_b1"), 0.0)
    hyp = mm(g1, w_("hd_w2")) + b_("hd_b2")                     # [rows, 512]
    mu = hyp[:, :D]
    sigma = _softplus(hyp[:, D:2 * D]) + 1e-6

    # --- latent_bottleneck[2] -> decoder_input_proj -> quantize ---
    ybot = mm(yb, w_("lb_w2")) + b_("lb_b2")                    # [rows, 128] (cols 8: zero-pad)
    y_proj = mm(ybot, w_("dip_w")) + b_("dip_b")                # [rows, 256]
    y_t = jnp.round(y_proj)

    # --- channel encoder -> gumbel_sigmoid (eval: soft; uniform draw from input) -> QPSK map ---
    bl = mm(y_t, a_("ce_w")) + b_("ce_b")                       # [rows, 128]
    u = noise_ref[:, :C]
    g = -jnp.log(-jnp.log(u + 1e-20) + 1e-20)
    bits = _sigmoid(bl + g)
    # map_to_constellation with bps=2 reduces to the elementwise map (2*bit - 1)/sqrt(7/3)
    tx = (2.0 * bits - 1.0) * _QPSK_SCALE
    # mod_probs == 1 (K=1), so the Tx_stack / dec_stack weighted sums are identities.

    # --- PowerNormalize (per independent forward group) ---
    # TODO(synk): PowerNormalize source not provided; DeepSC-style global conditional norm used.
    inv_pow = jax.lax.rsqrt(jnp.mean(tx * tx))
    tx = tx * jnp.minimum(1.0, inv_pow)
    # --- AWGN channel ---
    # TODO(synk): Channels().AWGN source not provided; Rx = Tx + n_var * N(0,1) (n_var as std).
    rx = tx + nv * noise_ref[:, C:2 * C]

    # --- channel decoder + classification head ---
    feat = mm(rx, w_("cd_w")) + b_("cd_b")                      # [rows, 256]
    d1 = jnp.maximum(mm(feat, a_("dec_w1")) + b_("dec_b1"), 0.0)
    logits_pad = mm(d1, a_("dec_w2")) + b_("dec_b2")            # [rows, 128]; cols 2: exact zeros

    # --- rate loss: -log2(discrete_probability(y_t, mu, sigma) + 1e-9).sum(1).mean() ---
    inv = 1.0 / (sigma * _SQRT2)
    lower = (y_t - 0.5 - mu) * inv
    upper = (y_t + 0.5 - mu) * inv
    p = jnp.maximum(0.5 * (jax.lax.erf(upper) - jax.lax.erf(lower)), 1e-12)
    rate = -jnp.sum(jnp.log(p + 1e-9), keepdims=True) * (_INV_LN2 / rows)   # [1, 1]

    # single lane-dense (rows,128) store: cols 0:2 logits, col 2 rate, rest zero
    lane = jax.lax.broadcasted_iota(jnp.int32, (rows, 128), 1)
    out_ref[...] = jnp.where(lane == 2, rate, logits_pad)


def init_params(key, vocab):
    """torch.nn.Linear-style init (U(-1/sqrt(fan_in), 1/sqrt(fan_in))), bf16 weights / f32 biases."""
    bf16 = jnp.bfloat16

    def lin(k, fan_in, fan_out):
        k1, k2 = jax.random.split(k)
        bound = 1.0 / math.sqrt(fan_in)
        w = jax.random.uniform(k1, (fan_in, fan_out), jnp.float32, -bound, bound)
        b = jax.random.uniform(k2, (1, fan_out), jnp.float32, -bound, bound)
        return w, b

    def pad_cols(x, n):
        return jnp.pad(x, ((0, 0), (0, n - x.shape[1])))

    def pad_rows(x, n):
        return jnp.pad(x, ((0, n - x.shape[0]), (0, 0)))

    keys = jax.random.split(key, 13)
    p = {}
    w, b = lin(keys[0], 768, D); p["proj_w"], p["proj_b"] = w.astype(bf16), b          # projection
    w, b = lin(keys[1], D + 1, HID)                                                    # hyper_encoder[0]
    p["he_w1a"], p["he_w1b"], p["he_b1"] = w[:D].astype(bf16), w[D:], b                # snr row kept f32
    w, b = lin(keys[2], HID, D); p["he_w2"], p["he_b2"] = w.astype(bf16), b            # hyper_encoder[2]
    w, b = lin(keys[3], D, HID); p["hd_w1"], p["hd_b1"] = w.astype(bf16), b            # hyper_decoder[0]
    w, b = lin(keys[4], HID, 2 * D + K_MOD)                                            # hyper_decoder[2]
    p["hd_w2"], p["hd_b2"] = w[:, :2 * D].astype(bf16), b[:, :2 * D]                   # mod_logits col dropped (K=1)
    w, b = lin(keys[5], D, HID); p["lb_w1"], p["lb_b1"] = w.astype(bf16), b            # latent_bottleneck[0]
    w, b = lin(keys[6], HID, 8)                                                        # latent_bottleneck[2]
    p["lb_w2"], p["lb_b2"] = pad_cols(w, 128).astype(bf16), pad_cols(b, 128)           # zero-padded to 128 lanes
    w, b = lin(keys[7], 8, D)                                                          # decoder_input_proj
    p["dip_w"], p["dip_b"] = pad_rows(w, 128).astype(bf16), b                          # zero-padded rows
    w, b = lin(keys[8], D, NS * 2); p["ce_w"], p["ce_b"] = w.astype(bf16), b           # channel_encoders[0]
    w, b = lin(keys[9], 2 * NS, D); p["cd_w"], p["cd_b"] = w.astype(bf16), b           # channel_decoders[0]
    w, b = lin(keys[10], D, 256); p["dec_w1"], p["dec_b1"] = w.astype(bf16), b         # decoder[0]
    w, b = lin(keys[11], 256, 2)                                                       # decoder[2]
    p["dec_w2"], p["dec_b2"] = pad_cols(w, 128).astype(bf16), pad_cols(b, 128)         # lane-dense output pad
    # stand-in encoder table stored bf16 so the gathered CLS rows arrive bf16 (halves DMA)
    p["emb"] = (jax.random.normal(keys[12], (vocab, 768), jnp.float32) * 0.02).astype(bf16)
    return p


def prepare_packed(p):
    """Pack weights once at init time; the per-call path only gathers + launches the kernel."""
    wA = jnp.concatenate([p[n] for n in _A_ORDER], axis=1)                              # [256, 896]  bf16
    wB = jnp.concatenate([p[n] for n in _B_ORDER], axis=1)                              # [128, 1408] bf16
    bias = jnp.concatenate([p[n].astype(jnp.float32) for n, _ in _BIAS_ORDER], axis=1)  # [1, 2688]   f32
    return {"emb": p["emb"], "proj_w": p["proj_w"], "wA": wA, "wB": wB, "bias": bias}


@partial(jax.jit, static_argnames=("group",))
def mod_jscc_forward(packed, input_ids, attention_mask, n_var, noise, group=TB):
    # TODO(synk): pretrained RoBERTa backbone is not translatable without weights; its CLS
    # hidden state is replaced by a deterministic embedding lookup of the position-0 token
    # (attention_mask accepted but unused, as for the CLS token).
    del attention_mask
    cls = packed["emb"][input_ids[:, 0]]                       # [B, 768] bf16
    B = cls.shape[0]
    G = B // group                                             # independent forward groups

    # fold per-row n_var into the noise buffer as a 128-lane broadcast group (no extra ref)
    nvar_bcast = jnp.broadcast_to(n_var.reshape(B, 1).astype(jnp.float32), (B, C))
    noise_all = jnp.concatenate([noise.astype(jnp.float32), nvar_bcast], axis=1)  # [B, 384]

    out = pl.pallas_call(
        jscc_kernel,
        out_shape=jax.ShapeDtypeStruct((B, 128), jnp.float32),
        grid=(G,),
        in_specs=[
            pl.BlockSpec((group, 768), lambda i: (i, 0)),        # cls        (per-group tile)
            pl.BlockSpec((group, 3 * C), lambda i: (i, 0)),      # noise|nvar (per-group tile)
            pl.BlockSpec((768, D), lambda i: (0, 0)),            # proj_w     (VMEM-resident)
            pl.BlockSpec((D, A_COLS), lambda i: (0, 0)),         # wA         (VMEM-resident)
            pl.BlockSpec((HID, B_COLS), lambda i: (0, 0)),       # wB         (VMEM-resident)
            pl.BlockSpec((1, BIAS_COLS), lambda i: (0, 0)),      # bias pack  (VMEM-resident)
        ],
        out_specs=pl.BlockSpec((group, 128), lambda i: (i, 0)),
        compiler_params=pltpu.CompilerParams(dimension_semantics=("parallel",)),
    )(cls, noise_all, packed["proj_w"], packed["wA"], packed["wB"], packed["bias"])

    logits = out[:, :2]
    rate_loss = out.reshape(G, group, 128)[:, 0, 2]            # one scalar per forward group
    # K = len(M_list) = 1: eval-mode F.gumbel_softmax over a singleton dim is exactly 1.
    mod_probs = jnp.ones((B, 1), jnp.float32)
    return logits, rate_loss, mod_probs


def reference_forward(params, input_ids, attention_mask, n_var, noise, group=TB):
    """Pure-JAX reference mirroring the eval-mode PyTorch forward, one module call per group."""
    del attention_mask
    p = params
    f32, bf16 = jnp.float32, jnp.bfloat16
    B = input_ids.shape[0]
    G = B // group

    def mm(x, w):
        return jnp.dot(x.astype(bf16), w, preferred_element_type=f32)

    logits_all, rates = [], []
    for gi in range(G):
        sl = slice(gi * group, (gi + 1) * group)
        cls = p["emb"][input_ids[sl, 0]]
        nv = n_var[sl].reshape(-1, 1).astype(f32)
        nz = noise[sl].astype(f32)

        y = mm(cls, p["proj_w"]) + p["proj_b"]
        snr = -jnp.log(nv)
        h1 = jax.nn.relu(mm(y, p["he_w1a"]) + snr * p["he_w1b"] + p["he_b1"])
        z = mm(h1, p["he_w2"]) + p["he_b2"]
        z_t = jnp.round(z)
        g1 = jax.nn.relu(mm(z_t, p["hd_w1"]) + p["hd_b1"])
        hyp = mm(g1, p["hd_w2"]) + p["hd_b2"]
        mu, raw_sigma = hyp[:, :D], hyp[:, D:2 * D]
        sigma = _softplus(raw_sigma) + 1e-6
        yb = jax.nn.relu(mm(y, p["lb_w1"]) + p["lb_b1"])
        ybot = mm(yb, p["lb_w2"]) + p["lb_b2"]
        y_proj = mm(ybot, p["dip_w"]) + p["dip_b"]
        y_t = jnp.round(y_proj)
        bl = mm(y_t, p["ce_w"]) + p["ce_b"]
        u = nz[:, :C]
        g = -jnp.log(-jnp.log(u + 1e-20) + 1e-20)
        bits = _sigmoid(bl + g)
        tx = (2.0 * bits - 1.0) * _QPSK_SCALE
        inv_pow = jax.lax.rsqrt(jnp.mean(tx * tx))
        tx = tx * jnp.minimum(1.0, inv_pow)
        rx = tx + nv * nz[:, C:2 * C]
        feat = mm(rx, p["cd_w"]) + p["cd_b"]
        d1 = jax.nn.relu(mm(feat, p["dec_w1"]) + p["dec_b1"])
        logits = (mm(d1, p["dec_w2"]) + p["dec_b2"])[:, :2]
        inv = 1.0 / (sigma * _SQRT2)
        lower = (y_t - 0.5 - mu) * inv
        upper = (y_t + 0.5 - mu) * inv
        prob = jnp.maximum(0.5 * (jax.lax.erf(upper) - jax.lax.erf(lower)), 1e-12)
        rate = jnp.mean(-jnp.sum(jnp.log(prob + 1e-9), axis=1) * _INV_LN2)
        logits_all.append(logits)
        rates.append(rate)

    mod_probs = jnp.ones((B, 1), f32)
    return jnp.concatenate(logits_all, axis=0), jnp.stack(rates), mod_probs


if __name__ == "__main__":
    G, L, VOCAB = 2, 8, 50
    B = G * TB                                   # 32 samples = 2 independent 16-row forwards

    key = jax.random.PRNGKey(0)
    kp, kid, knv, ku, kn = jax.random.split(key, 5)
    params = init_params(kp, VOCAB)
    packed = prepare_packed(params)              # packed ONCE, reused by every jit'ed call

    input_ids = jax.random.randint(kid, (B, L), 0, VOCAB, dtype=jnp.int32)
    attention_mask = jnp.ones((B, L), jnp.int32)
    n_var = jax.random.uniform(knv, (B,), jnp.float32, 0.3, 1.0)
    gumbel_u = jax.random.uniform(ku, (B, C), jnp.float32)       # gumbel_sigmoid uniform draw
    awgn = jax.random.normal(kn, (B, C), jnp.float32)            # AWGN standard-normal draw
    noise = jnp.concatenate([gumbel_u, awgn], axis=1)            # [B, 256]

    logits, rate_loss, mod_probs = mod_jscc_forward(packed, input_ids, attention_mask, n_var, noise)
    (logits, rate_loss, mod_probs) = jax.block_until_ready((logits, rate_loss, mod_probs))

    ref_logits, ref_rates, ref_mod = reference_forward(params, input_ids, attention_mask, n_var, noise)

    assert logits.shape == (B, 2) and rate_loss.shape == (G,) and mod_probs.shape == (B, 1)
    assert jnp.allclose(logits, ref_logits, rtol=2e-3, atol=2e-3)
    assert jnp.allclose(rate_loss, ref_rates, rtol=2e-3, atol=2e-3)
    assert jnp.allclose(mod_probs, ref_mod)
    print("KERNEL_OK")
</pallas_src>

<mosaic_0001>
module attributes {stable_mosaic.version = 11 : i64} {
  func.func @jscc_kernel(%arg0: i32, %arg1: memref<16x768xbf16, #tpu.memory_space<vmem>>, %arg2: memref<16x384xf32, #tpu.memory_space<vmem>>, %arg3: memref<768x256xbf16, #tpu.memory_space<vmem>>, %arg4: memref<256x896xbf16, #tpu.memory_space<vmem>>, %arg5: memref<128x1408xbf16, #tpu.memory_space<vmem>>, %arg6: memref<1x2688xf32, #tpu.memory_space<vmem>>, %arg7: memref<16x128xf32, #tpu.memory_space<vmem>>) attributes {dimension_semantics = [#tpu.dimension_semantics<parallel>], iteration_bounds = array<i64: 2>, scalar_prefetch = 0 : i64, scratch_operands = 0 : i64, tpu.core_type = #tpu.core_type<tc>, window_params = [{transform_indices = @transform_0, window_bounds = array<i64: 16, 768>}, {transform_indices = @transform_1, window_bounds = array<i64: 16, 384>}, {pipeline_mode = #tpu.pipeline_mode<synchronous>, transform_indices = @transform_2, window_bounds = array<i64: 768, 256>}, {pipeline_mode = #tpu.pipeline_mode<synchronous>, transform_indices = @transform_3, window_bounds = array<i64: 256, 896>}, {pipeline_mode = #tpu.pipeline_mode<synchronous>, transform_indices = @transform_4, window_bounds = array<i64: 128, 1408>}, {pipeline_mode = #tpu.pipeline_mode<synchronous>, transform_indices = @transform_5, window_bounds = array<i64: 1, 2688>}, {transform_indices = @transform_6, window_bounds = array<i64: 16, 128>}]} {
    %c0 = arith.constant 0 : index
    %c0_0 = arith.constant 0 : index
    %0 = vector.load %arg1[%c0, %c0_0] : memref<16x768xbf16, #tpu.memory_space<vmem>>, vector<16x768xbf16>
    %c0_1 = arith.constant 0 : index
    %c0_2 = arith.constant 0 : index
    %1 = vector.load %arg3[%c0_1, %c0_2] : memref<768x256xbf16, #tpu.memory_space<vmem>>, vector<768x256xbf16>
    %cst = arith.constant dense<0.000000e+00> : vector<16x256xf32>
    %2 = tpu.matmul %0, %1, %cst {dimension_numbers = #tpu.dot_dimension_numbers<[1], [0], [0], [1], [0, 0, 1, 1], [], []>} : vector<16x768xbf16>, vector<768x256xbf16>, vector<16x256xf32> -> vector<16x256xf32>
    %c0_3 = arith.constant 0 : index
    %c0_4 = arith.constant 0 : index
    %3 = vector.load %arg6[%c0_3, %c0_4] : memref<1x2688xf32, #tpu.memory_space<vmem>>, vector<1x256xf32>
    %4 = vector.broadcast %3 : vector<1x256xf32> to vector<16x256xf32>
    %5 = arith.addf %2, %4 : vector<16x256xf32>
    %c0_5 = arith.constant 0 : index
    %c256 = arith.constant 256 : index
    %6 = vector.load %arg2[%c0_5, %c256] : memref<16x384xf32, #tpu.memory_space<vmem>>, vector<16x128xf32>
    %7 = math.log %6 : vector<16x128xf32>
    %cst_6 = arith.constant 0.000000e+00 : f32
    %8 = vector.broadcast %cst_6 : f32 to vector<16x128xf32>
    %9 = arith.subf %8, %7 : vector<16x128xf32>
    %c0_7 = arith.constant 0 : index
    %c0_8 = arith.constant 0 : index
    %10 = vector.load %arg4[%c0_7, %c0_8] : memref<256x896xbf16, #tpu.memory_space<vmem>>, vector<256x256xbf16>
    %11 = arith.truncf %5 : vector<16x256xf32> to vector<16x256xbf16>
    %cst_9 = arith.constant dense<0.000000e+00> : vector<16x256xf32>
    %12 = tpu.matmul %11, %10, %cst_9 {dimension_numbers = #tpu.dot_dimension_numbers<[1], [0], [0], [1], [0, 0, 1, 1], [], []>} : vector<16x256xbf16>, vector<256x256xbf16>, vector<16x256xf32> -> vector<16x256xf32>
    %13 = vector.extract_strided_slice %12 {offsets = [0, 0], sizes = [16, 128], strides = [1, 1]} : vector<16x256xf32> to vector<16x128xf32>
    %c0_10 = arith.constant 0 : index
    %c2560 = arith.constant 2560 : index
    %14 = vector.load %arg6[%c0_10, %c2560] : memref<1x2688xf32, #tpu.memory_space<vmem>>, vector<1x128xf32>
    %15 = vector.broadcast %14 : vector<1x128xf32> to vector<16x128xf32>
    %16 = arith.mulf %9, %15 : vector<16x128xf32>
    %17 = arith.addf %13, %16 : vector<16x128xf32>
    %c0_11 = arith.constant 0 : index
    %c256_12 = arith.constant 256 : index
    %18 = vector.load %arg6[%c0_11, %c256_12] : memref<1x2688xf32, #tpu.memory_space<vmem>>, vector<1x128xf32>
    %19 = vector.broadcast %18 : vector<1x128xf32> to vector<16x128xf32>
    %20 = arith.addf %17, %19 : vector<16x128xf32>
    %cst_13 = arith.constant 0.000000e+00 : f32
    %21 = vector.broadcast %cst_13 : f32 to vector<16x128xf32>
    %22 = arith.maximumf %20, %21 : vector<16x128xf32>
    %23 = vector.extract_strided_slice %12 {offsets = [0, 128], sizes = [16, 128], strides = [1, 1]} : vector<16x256xf32> to vector<16x128xf32>
    %c0_14 = arith.constant 0 : index
    %c1280 = arith.constant 1280 : index
    %24 = vector.load %arg6[%c0_14, %c1280] : memref<1x2688xf32, #tpu.memory_space<vmem>>, vector<1x128xf32>
    %25 = vector.broadcast %24 : vector<1x128xf32> to vector<16x128xf32>
    %26 = arith.addf %23, %25 : vector<16x128xf32>
    %cst_15 = arith.constant 0.000000e+00 : f32
    %27 = vector.broadcast %cst_15 : f32 to vector<16x128xf32>
    %28 = arith.maximumf %26, %27 : vector<16x128xf32>
    %c0_16 = arith.constant 0 : index
    %c0_17 = arith.constant 0 : index
    %29 = vector.load %arg5[%c0_16, %c0_17] : memref<128x1408xbf16, #tpu.memory_space<vmem>>, vector<128x256xbf16>
    %30 = arith.truncf %22 : vector<16x128xf32> to vector<16x128xbf16>
    %cst_18 = arith.constant dense<0.000000e+00> : vector<16x256xf32>
    %31 = tpu.matmul %30, %29, %cst_18 {dimension_numbers = #tpu.dot_dimension_numbers<[1], [0], [0], [1], [0, 0, 1, 1], [], []>} : vector<16x128xbf16>, vector<128x256xbf16>, vector<16x256xf32> -> vector<16x256xf32>
    %c0_19 = arith.constant 0 : index
    %c384 = arith.constant 384 : index
    %32 = vector.load %arg6[%c0_19, %c384] : memref<1x2688xf32, #tpu.memory_space<vmem>>, vector<1x256xf32>
    %33 = vector.broadcast %32 : vector<1x256xf32> to vector<16x256xf32>
    %34 = arith.addf %31, %33 : vector<16x256xf32>
    %35 = math.roundeven %34 : vector<16x256xf32>
    %c0_20 = arith.constant 0 : index
    %c256_21 = arith.constant 256 : index
    %36 = vector.load %arg4[%c0_20, %c256_21] : memref<256x896xbf16, #tpu.memory_space<vmem>>, vector<256x128xbf16>
    %37 = arith.truncf %35 : vector<16x256xf32> to vector<16x256xbf16>
    %cst_22 = arith.constant dense<0.000000e+00> : vector<16x128xf32>
    %38 = tpu.matmul %37, %36, %cst_22 {dimension_numbers = #tpu.dot_dimension_numbers<[1], [0], [0], [1], [0, 0, 1, 1], [], []>} : vector<16x256xbf16>, vector<256x128xbf16>, vector<16x128xf32> -> vector<16x128xf32>
    %c0_23 = arith.constant 0 : index
    %c640 = arith.constant 640 : index
    %39 = vector.load %arg6[%c0_23, %c640] : memref<1x2688xf32, #tpu.memory_space<vmem>>, vector<1x128xf32>
    %40 = vector.broadcast %39 : vector<1x128xf32> to vector<16x128xf32>
    %41 = arith.addf %38, %40 : vector<16x128xf32>
    %cst_24 = arith.constant 0.000000e+00 : f32
    %42 = vector.broadcast %cst_24 : f32 to vector<16x128xf32>
    %43 = arith.maximumf %41, %42 : vector<16x128xf32>
    %c0_25 = arith.constant 0 : index
    %c256_26 = arith.constant 256 : index
    %44 = vector.load %arg5[%c0_25, %c256_26] : memref<128x1408xbf16, #tpu.memory_space<vmem>>, vector<128x512xbf16>
    %45 = arith.truncf %43 : vector<16x128xf32> to vector<16x128xbf16>
    %cst_27 = arith.constant dense<0.000000e+00> : vector<16x512xf32>
    %46 = tpu.matmul %45, %44, %cst_27 {dimension_numbers = #tpu.dot_dimension_numbers<[1], [0], [0], [1], [0, 0, 1, 1], [], []>} : vector<16x128xbf16>, vector<128x512xbf16>, vector<16x512xf32> -> vector<16x512xf32>
    %c0_28 = arith.constant 0 : index
    %c768 = arith.constant 768 : index
    %47 = vector.load %arg6[%c0_28, %c768] : memref<1x2688xf32, #tpu.memory_space<vmem>>, vector<1x512xf32>
    %48 = vector.broadcast %47 : vector<1x512xf32> to vector<16x512xf32>
    %49 = arith.addf %46, %48 : vector<16x512xf32>
    %50 = vector.extract_strided_slice %49 {offsets = [0, 0], sizes = [16, 256], strides = [1, 1]} : vector<16x512xf32> to vector<16x256xf32>
    %51 = vector.extract_strided_slice %49 {offsets = [0, 256], sizes = [16, 256], strides = [1, 1]} : vector<16x512xf32> to vector<16x256xf32>
    %cst_29 = arith.constant 0.000000e+00 : f32
    %52 = vector.broadcast %cst_29 : f32 to vector<16x256xf32>
    %53 = arith.maximumf %51, %52 : vector<16x256xf32>
    %54 = math.absf %51 : vector<16x256xf32>
    %cst_30 = arith.constant 0.000000e+00 : f32
    %55 = vector.broadcast %cst_30 : f32 to vector<16x256xf32>
    %56 = arith.subf %55, %54 : vector<16x256xf32>
    %57 = math.exp %56 : vector<16x256xf32>
    %cst_31 = arith.constant 1.000000e+00 : f32
    %58 = vector.broadcast %cst_31 : f32 to vector<16x256xf32>
    %59 = arith.addf %58, %57 : vector<16x256xf32>
    %60 = math.log %59 : vector<16x256xf32>
    %61 = arith.addf %53, %60 : vector<16x256xf32>
    %cst_32 = arith.constant 9.99999997E-7 : f32
    %62 = vector.broadcast %cst_32 : f32 to vector<16x256xf32>
    %63 = arith.addf %61, %62 : vector<16x256xf32>
    %c0_33 = arith.constant 0 : index
    %c768_34 = arith.constant 768 : index
    %64 = vector.load %arg5[%c0_33, %c768_34] : memref<128x1408xbf16, #tpu.memory_space<vmem>>, vector<128x128xbf16>
    %65 = arith.truncf %28 : vector<16x128xf32> to vector<16x128xbf16>
    %cst_35 = arith.constant dense<0.000000e+00> : vector<16x128xf32>
    %66 = tpu.matmul %65, %64, %cst_35 {dimension_numbers = #tpu.dot_dimension_numbers<[1], [0], [0], [1], [0, 0, 1, 1], [], []>} : vector<16x128xbf16>, vector<128x128xbf16>, vector<16x128xf32> -> vector<16x128xf32>
    %c0_36 = arith.constant 0 : index
    %c1408 = arith.constant 1408 : index
    %67 = vector.load %arg6[%c0_36, %c1408] : memref<1x2688xf32, #tpu.memory_space<vmem>>, vector<1x128xf32>
    %68 = vector.broadcast %67 : vector<1x128xf32> to vector<16x128xf32>
    %69 = arith.addf %66, %68 : vector<16x128xf32>
    %c0_37 = arith.constant 0 : index
    %c1152 = arith.constant 1152 : index
    %70 = vector.load %arg5[%c0_37, %c1152] : memref<128x1408xbf16, #tpu.memory_space<vmem>>, vector<128x256xbf16>
    %71 = arith.truncf %69 : vector<16x128xf32> to vector<16x128xbf16>
    %cst_38 = arith.constant dense<0.000000e+00> : vector<16x256xf32>
    %72 = tpu.matmul %71, %70, %cst_38 {dimension_numbers = #tpu.dot_dimension_numbers<[1], [0], [0], [1], [0, 0, 1, 1], [], []>} : vector<16x128xbf16>, vector<128x256xbf16>, vector<16x256xf32> -> vector<16x256xf32>
    %c0_39 = arith.constant 0 : index
    %c1536 = arith.constant 1536 : index
    %73 = vector.load %arg6[%c0_39, %c1536] : memref<1x2688xf32, #tpu.memory_space<vmem>>, vector<1x256xf32>
    %74 = vector.broadcast %73 : vector<1x256xf32> to vector<16x256xf32>
    %75 = arith.addf %72, %74 : vector<16x256xf32>
    %76 = math.roundeven %75 : vector<16x256xf32>
    %c0_40 = arith.constant 0 : index
    %c384_41 = arith.constant 384 : index
    %77 = vector.load %arg4[%c0_40, %c384_41] : memref<256x896xbf16, #tpu.memory_space<vmem>>, vector<256x128xbf16>
    %78 = arith.truncf %76 : vector<16x256xf32> to vector<16x256xbf16>
    %cst_42 = arith.constant dense<0.000000e+00> : vector<16x128xf32>
    %79 = tpu.matmul %78, %77, %cst_42 {dimension_numbers = #tpu.dot_dimension_numbers<[1], [0], [0], [1], [0, 0, 1, 1], [], []>} : vector<16x256xbf16>, vector<256x128xbf16>, vector<16x128xf32> -> vector<16x128xf32>
    %c0_43 = arith.constant 0 : index
    %c1792 = arith.constant 1792 : index
    %80 = vector.load %arg6[%c0_43, %c1792] : memref<1x2688xf32, #tpu.memory_space<vmem>>, vector<1x128xf32>
    %81 = vector.broadcast %80 : vector<1x128xf32> to vector<16x128xf32>
    %82 = arith.addf %79, %81 : vector<16x128xf32>
    %c0_44 = arith.constant 0 : index
    %c0_45 = arith.constant 0 : index
    %83 = vector.load %arg2[%c0_44, %c0_45] : memref<16x384xf32, #tpu.memory_space<vmem>>, vector<16x128xf32>
    %cst_46 = arith.constant 9.99999968E-21 : f32
    %84 = vector.broadcast %cst_46 : f32 to vector<16x128xf32>
    %85 = arith.addf %83, %84 : vector<16x128xf32>
    %86 = math.log %85 : vector<16x128xf32>
    %cst_47 = arith.constant 0.000000e+00 : f32
    %87 = vector.broadcast %cst_47 : f32 to vector<16x128xf32>
    %88 = arith.subf %87, %86 : vector<16x128xf32>
    %cst_48 = arith.constant 9.99999968E-21 : f32
    %89 = vector.broadcast %cst_48 : f32 to vector<16x128xf32>
    %90 = arith.addf %88, %89 : vector<16x128xf32>
    %91 = math.log %90 : vector<16x128xf32>
    %cst_49 = arith.constant 0.000000e+00 : f32
    %92 = vector.broadcast %cst_49 : f32 to vector<16x128xf32>
    %93 = arith.subf %92, %91 : vector<16x128xf32>
    %94 = arith.addf %82, %93 : vector<16x128xf32>
    %cst_50 = arith.constant 0.000000e+00 : f32
    %95 = vector.broadcast %cst_50 : f32 to vector<16x128xf32>
    %96 = arith.subf %95, %94 : vector<16x128xf32>
    %97 = math.exp %96 : vector<16x128xf32>
    %cst_51 = arith.constant 1.000000e+00 : f32
    %98 = vector.broadcast %cst_51 : f32 to vector<16x128xf32>
    %99 = arith.addf %98, %97 : vector<16x128xf32>
    %cst_52 = arith.constant 1.000000e+00 : f32
    %100 = vector.broadcast %cst_52 : f32 to vector<16x128xf32>
    %101 = arith.divf %100, %99 : vector<16x128xf32>
    %cst_53 = arith.constant 2.000000e+00 : f32
    %102 = vector.broadcast %cst_53 : f32 to vector<16x128xf32>
    %103 = arith.mulf %102, %101 : vector<16x128xf32>
    %cst_54 = arith.constant 1.000000e+00 : f32
    %104 = vector.broadcast %cst_54 : f32 to vector<16x128xf32>
    %105 = arith.subf %103, %104 : vector<16x128xf32>
    %cst_55 = arith.constant 0.654653668 : f32
    %106 = vector.broadcast %cst_55 : f32 to vector<16x128xf32>
    %107 = arith.mulf %105, %106 : vector<16x128xf32>
    %108 = arith.mulf %107, %107 : vector<16x128xf32>
    %109 = vector.shape_cast %108 : vector<16x128xf32> to vector<1x16x128xf32>
    %cst_56 = arith.constant dense<0.000000e+00> : vector<1xf32>
    %110 = vector.multi_reduction <add>, %109, %cst_56 [1, 2] : vector<1x16x128xf32> to vector<1xf32>
    %111 = vector.shape_cast %110 : vector<1xf32> to vector<1x1x1xf32>
    %112 = vector.extract %111[0, 0, 0] : f32 from vector<1x1x1xf32>
    %cst_57 = arith.constant 2.048000e+03 : f32
    %113 = arith.divf %112, %cst_57 : f32
    %114 = math.rsqrt %113 : f32
    %cst_58 = arith.constant 1.000000e+00 : f32
    %115 = arith.minimumf %cst_58, %114 : f32
    %116 = vector.broadcast %115 : f32 to vector<16x128xf32>
    %117 = arith.mulf %107, %116 : vector<16x128xf32>
    %c0_59 = arith.constant 0 : index
    %c128 = arith.constant 128 : index
    %118 = vector.load %arg2[%c0_59, %c128] : memref<16x384xf32, #tpu.memory_space<vmem>>, vector<16x128xf32>
    %119 = arith.mulf %6, %118 : vector<16x128xf32>
    %120 = arith.addf %117, %119 : vector<16x128xf32>
    %c0_60 = arith.constant 0 : index
    %c896 = arith.constant 896 : index
    %121 = vector.load %arg5[%c0_60, %c896] : memref<128x1408xbf16, #tpu.memory_space<vmem>>, vector<128x256xbf16>
    %122 = arith.truncf %120 : vector<16x128xf32> to vector<16x128xbf16>
    %cst_61 = arith.constant dense<0.000000e+00> : vector<16x256xf32>
    %123 = tpu.matmul %122, %121, %cst_61 {dimension_numbers = #tpu.dot_dimension_numbers<[1], [0], [0], [1], [0, 0, 1, 1], [], []>} : vector<16x128xbf16>, vector<128x256xbf16>, vector<16x256xf32> -> vector<16x256xf32>
    %c0_62 = arith.constant 0 : index
    %c1920 = arith.constant 1920 : index
    %124 = vector.load %arg6[%c0_62, %c1920] : memref<1x2688xf32, #tpu.memory_space<vmem>>, vector<1x256xf32>
    %125 = vector.broadcast %124 : vector<1x256xf32> to vector<16x256xf32>
    %126 = arith.addf %123, %125 : vector<16x256xf32>
    %c0_63 = arith.constant 0 : index
    %c512 = arith.constant 512 : index
    %127 = vector.load %arg4[%c0_63, %c512] : memref<256x896xbf16, #tpu.memory_space<vmem>>, vector<256x256xbf16>
    %128 = arith.truncf %126 : vector<16x256xf32> to vector<16x256xbf16>
    %cst_64 = arith.constant dense<0.000000e+00> : vector<16x256xf32>
    %129 = tpu.matmul %128, %127, %cst_64 {dimension_numbers = #tpu.dot_dimension_numbers<[1], [0], [0], [1], [0, 0, 1, 1], [], []>} : vector<16x256xbf16>, vector<256x256xbf16>, vector<16x256xf32> -> vector<16x256xf32>
    %c0_65 = arith.constant 0 : index
    %c2176 = arith.constant 2176 : index
    %130 = vector.load %arg6[%c0_65, %c2176] : memref<1x2688xf32, #tpu.memory_space<vmem>>, vector<1x256xf32>
    %131 = vector.broadcast %130 : vector<1x256xf32> to vector<16x256xf32>
    %132 = arith.addf %129, %131 : vector<16x256xf32>
    %cst_66 = arith.constant 0.000000e+00 : f32
    %133 = vector.broadcast %cst_66 : f32 to vector<16x256xf32>
    %134 = arith.maximumf %132, %133 : vector<16x256xf32>
    %c0_67 = arith.constant 0 : index
    %c768_68 = arith.constant 768 : index
    %135 = vector.load %arg4[%c0_67, %c768_68] : memref<256x896xbf16, #tpu.memory_space<vmem>>, vector<256x128xbf16>
    %136 = arith.truncf %134 : vector<16x256xf32> to vector<16x256xbf16>
    %cst_69 = arith.constant dense<0.000000e+00> : vector<16x128xf32>
    %137 = tpu.matmul %136, %135, %cst_69 {dimension_numbers = #tpu.dot_dimension_numbers<[1], [0], [0], [1], [0, 0, 1, 1], [], []>} : vector<16x256xbf16>, vector<256x128xbf16>, vector<16x128xf32> -> vector<16x128xf32>
    %c0_70 = arith.constant 0 : index
    %c2432 = arith.constant 2432 : index
    %138 = vector.load %arg6[%c0_70, %c2432] : memref<1x2688xf32, #tpu.memory_space<vmem>>, vector<1x128xf32>
    %139 = vector.broadcast %138 : vector<1x128xf32> to vector<16x128xf32>
    %140 = arith.addf %137, %139 : vector<16x128xf32>
    %cst_71 = arith.constant 1.41421354 : f32
    %141 = vector.broadcast %cst_71 : f32 to vector<16x256xf32>
    %142 = arith.mulf %63, %141 : vector<16x256xf32>
    %cst_72 = arith.constant 1.000000e+00 : f32
    %143 = vector.broadcast %cst_72 : f32 to vector<16x256xf32>
    %144 = arith.divf %143, %142 : vector<16x256xf32>
    %cst_73 = arith.constant 5.000000e-01 : f32
    %145 = vector.broadcast %cst_73 : f32 to vector<16x256xf32>
    %146 = arith.subf %76, %145 : vector<16x256xf32>
    %147 = arith.subf %146, %50 : vector<16x256xf32>
    %148 = arith.mulf %147, %144 : vector<16x256xf32>
    %cst_74 = arith.constant 5.000000e-01 : f32
    %149 = vector.broadcast %cst_74 : f32 to vector<16x256xf32>
    %150 = arith.addf %76, %149 : vector<16x256xf32>
    %151 = arith.subf %150, %50 : vector<16x256xf32>
    %152 = arith.mulf %151, %144 : vector<16x256xf32>
    %153 = math.erf %152 : vector<16x256xf32>
    %154 = math.erf %148 : vector<16x256xf32>
    %155 = arith.subf %153, %154 : vector<16x256xf32>
    %cst_75 = arith.constant 5.000000e-01 : f32
    %156 = vector.broadcast %cst_75 : f32 to vector<16x256xf32>
    %157 = arith.mulf %156, %155 : vector<16x256xf32>
    %cst_76 = arith.constant 9.99999996E-13 : f32
    %158 = vector.broadcast %cst_76 : f32 to vector<16x256xf32>
    %159 = arith.maximumf %157, %158 : vector<16x256xf32>
    %cst_77 = arith.constant 9.99999971E-10 : f32
    %160 = vector.broadcast %cst_77 : f32 to vector<16x256xf32>
    %161 = arith.addf %159, %160 : vector<16x256xf32>
    %162 = math.log %161 : vector<16x256xf32>
    %163 = vector.shape_cast %162 : vector<16x256xf32> to vector<1x16x256xf32>
    %cst_78 = arith.constant dense<0.000000e+00> : vector<1xf32>
    %164 = vector.multi_reduction <add>, %163, %cst_78 [1, 2] : vector<1x16x256xf32> to vector<1xf32>
    %165 = vector.shape_cast %164 : vector<1xf32> to vector<1x1x1xf32>
    %166 = vector.extract %165[0, 0, 0] : f32 from vector<1x1x1xf32>
    %167 = vector.broadcast %166 : f32 to vector<1x1xf32>
    %cst_79 = arith.constant 0.000000e+00 : f32
    %168 = vector.broadcast %cst_79 : f32 to vector<1x1xf32>
    %169 = arith.subf %168, %167 : vector<1x1xf32>
    %cst_80 = arith.constant 0.0901684388 : f32
    %170 = vector.broadcast %cst_80 : f32 to vector<1x1xf32>
    %171 = arith.mulf %169, %170 : vector<1x1xf32>
    %172 = tpu.iota {dimensions = array<i32: 1>} : vector<16x128xi32>
    %c2_i32 = arith.constant 2 : i32
    %173 = vector.broadcast %c2_i32 : i32 to vector<16x128xi32>
    %174 = arith.cmpi eq, %172, %173 : vector<16x128xi32>
    %175 = vector.shape_cast %171 : vector<1x1xf32> to vector<1x1xf32>
    %176 = vector.broadcast %175 : vector<1x1xf32> to vector<16x128xf32>
    %177 = arith.select %174, %176, %140 : vector<16x128xi1>, vector<16x128xf32>
    %c0_81 = arith.constant 0 : index
    %c0_82 = arith.constant 0 : index
    %178 = vector.load %arg7[%c0_81, %c0_82] : memref<16x128xf32, #tpu.memory_space<vmem>>, vector<16x128xf32>
    tpu.vector_store %arg7[%c0_81, %c0_82], %177 {strides = array<i32>} : memref<16x128xf32, #tpu.memory_space<vmem>>, vector<16x128xf32>,
    return
  }
  func.func @transform_0(%arg0: i32) -> (i32, i32) {
    %c0_i32 = arith.constant 0 : i32
    %c0_i32_0 = arith.constant 0 : i32
    return %arg0, %c0_i32 : i32, i32
  }
  func.func @transform_1(%arg0: i32) -> (i32, i32) {
    %c0_i32 = arith.constant 0 : i32
    %c0_i32_0 = arith.constant 0 : i32
    return %arg0, %c0_i32 : i32, i32
  }
  func.func @transform_2(%arg0: i32) -> (i32, i32) {
    %c0_i32 = arith.constant 0 : i32
    %c0_i32_0 = arith.constant 0 : i32
    %c0_i32_1 = arith.constant 0 : i32
    return %c0_i32, %c0_i32_0 : i32, i32
  }
  func.func @transform_3(%arg0: i32) -> (i32, i32) {
    %c0_i32 = arith.constant 0 : i32
    %c0_i32_0 = arith.constant 0 : i32
    %c0_i32_1 = arith.constant 0 : i32
    return %c0_i32, %c0_i32_0 : i32, i32
  }
  func.func @transform_4(%arg0: i32) -> (i32, i32) {
    %c0_i32 = arith.constant 0 : i32
    %c0_i32_0 = arith.constant 0 : i32
    %c0_i32_1 = arith.constant 0 : i32
    return %c0_i32, %c0_i32_0 : i32, i32
  }
  func.func @transform_5(%arg0: i32) -> (i32, i32) {
    %c0_i32 = arith.constant 0 : i32
    %c0_i32_0 = arith.constant 0 : i32
    %c0_i32_1 = arith.constant 0 : i32
    return %c0_i32, %c0_i32_0 : i32, i32
  }
  func.func @transform_6(%arg0: i32) -> (i32, i32) {
    %c0_i32 = arith.constant 0 : i32
    %c0_i32_0 = arith.constant 0 : i32
    return %arg0, %c0_i32 : i32, i32
  }
}

</mosaic_0001>

<bundles_post_ra>
// kernel: mod_jscc_forward.1
= control target key start
LH: loop header
LB: loop body
LE: loop exit
PB: predicated region body
PF: predicated region fallthrough
CT: control target
= control target key end

     0   :  { %11 = vsyncpa [#allocation3], 0  ;;  %s4972_s0 = inlined_call_operand.vmem [shape: bf16[32,768], index: 0, kind: input, shape index: {}]   ;;  %s4973_s1 = inlined_call_operand.vmem [shape: f32[32,384], index: 1, kind: input, shape index: {}]   ;;  %s4974_s2 = inlined_call_operand.hbm [shape: bf16[768,256], index: 2, kind: input, shape index: {}]   ;;  %s4975_s3 = inlined_call_operand.vmem [shape: bf16[256,896], index: 3, kind: input, shape index: {}]   ;;  %s4976_s4 = inlined_call_operand.hbm [shape: bf16[128,1408], index: 4, kind: input, shape index: {}]   ;;  %s4977_s5 = inlined_call_operand.vmem [shape: f32[1,2688], index: 5, kind: input, shape index: {}]   ;;  %s4978_s6 = inlined_call_operand.vmem [shape: f32[32,128], index: 6, kind: output, shape index: {}]  }
   0x1   :  { %12 = vsyncpa [#allocation5], 0  ;;  %s4443_s21 = smov 0  }
   0x2 LB: > { %s4398_s22 = smov [#allocation2]   ;;  %s3298_s24 = sadd.s32 4294967295, %s4396_s21   ;;  %s4396_s21 = sphi %s4443_s21, %s18_s21  }
   0x3   : > { %s197_s23 = sshll.u32 %s4398_s22, 4  ;;  %p3300_p0 = scmp.ge.s32.totalorder %s4396_s21, 1  ;;  %s198_s23 = int_to_ptr.vmem [resolvable:$true] %s197_s23 }
   0x4   : > { %p185_p1 = scmp.lt.s32.totalorder %s4396_s21, 3  ;;  %p4457_p3 = scmp.eq.s32.totalorder %s3298_s24, 0 }
   0x5   : > { %s4399_s27 = smov [#allocation4]   ;;  %s4341_s30 = scalar_lea.vmem %s198_s23, 12288 }
   0x6   : > { %p4451_p2 = pnand %p3300_p0, %p185_p1  ;;  %s213_s28 = sshll.u32 %s4399_s27, 4  ;;  %s214_s28 = int_to_ptr.vmem [resolvable:$true] %s213_s28 }
   0x7   : > { %p4342_p7 = scmp.ne.s32.totalorder %s198_s23, %s4341_s30  ;;  %p4349_p10 = scmp.lt.s32.totalorder %s198_s23, %s198_s23 }
   0x8   : > { %p3804_p4 = pneg %p4451_p2  ;;  %p4350_p11 = scmp.lt.s32.totalorder %s4341_s30, %s4341_s30 }
   0xa   : > { %p4465_p5 = pnand %p4457_p3, %p3804_p4  ;;  %p4351_p12 = por %p4350_p11, %p4349_p10 }
   0xc   : > { %p4332_p6 = pneg %p4465_p5 }
   0xe   : > { %p4344_p8 = pnand %p4342_p7, %p4332_p6 }
  0x10   : > { %p4345_p9 = pneg %p4344_p8 }
  0x12   : > { %p4352_p13 = pnand %p4351_p12, %p4345_p9 }
  0x14   : > { %4355 = shalt.err (!%p4352_p13)
}
  0x15   : > { %s4400_s7 = smov 128   ;;  %s4401_s8 = smov 8  }
  0x16   : > { %3807 = dma.hbm_to_vmem [thread:$0]  (!%p4465_p5), %s4974_s2, 12288, %s198_s23, [#allocation3], %s4400_s7, %s4400_s7, %s4401_s8  }
  0x17   : > { %s4367_s11 = scalar_lea.vmem %s214_s28, 11264  ;;  %p4375_p7 = scmp.lt.s32.totalorder %s214_s28, %s214_s28 }
  0x18   : > { %p4368_p0 = scmp.ne.s32.totalorder %s214_s28, %s4367_s11  ;;  %p4376_p8 = scmp.lt.s32.totalorder %s4367_s11, %s4367_s11 }
  0x1a   : > { %p4370_p1 = pnand %p4368_p0, %p4332_p6  ;;  %p4377_p10 = por %p4376_p8, %p4375_p7 }
  0x1c   : > { %p4371_p4 = pneg %p4370_p1 }
  0x1e   : > { %p4378_p9 = pnand %p4377_p10, %p4371_p4 }
  0x20   : > { %4381 = shalt.err (!%p4378_p9)
}
  0x21   : > { %s4402_s12 = smov 704   ;;  %s4403_s13 = smov 44  }
  0x22   : > { %3810 = dma.hbm_to_vmem [thread:$0]  (!%p4465_p5), %s4976_s4, 11264, %s214_s28, [#allocation5], %s4402_s12, %s4402_s12, %s4403_s13  }
  0x23   : > { %252 = sbr.rel (%p4451_p2) target bundleno = 2586 (0xa1a), region = 44 }
  0x28   : > { %4387 = dma.done.wait (%p4457_p3), [#allocation3], 12288  }
  0x29   : > { %4389 = vsyncadd (%p4457_p3), [#allocation3], 4294955008 }
  0x2a   : > { %4391 = dma.done.wait (%p4457_p3), [#allocation5], 11264  }
  0x2b   : > { %4393 = vsyncadd (%p4457_p3), [#allocation5], 4294956032  ;;  %v3833_v0 = vld [vmem:[#allocation2 + $0x74] ss:$8 sps:$4 sm:$0xff]   ;;  %v3835_v1 = vld [vmem:[#allocation2 + $0x70] ss:$8 sps:$4 sm:$0xff]  }
  0x2c   : > { %938 = vmatprep.subr.bf16.mxu0 %v3833_v0  ;;  %v3836_v2 = vld [vmem:[#allocation2 + $0x174] ss:$8 sps:$4 sm:$0xff]   ;;  %v3838_v3 = vld [vmem:[#allocation2 + $0x170] ss:$8 sps:$4 sm:$0xff]   ;;  %v3839_v4 = vld [vmem:[#allocation2 + $0x64] ss:$8 sps:$4 sm:$0xff]  }
  0x2d   : > { %939 = vmatpush1.bf16.msra.mxu0 %v3835_v1  ;;  %v3841_v5 = vld [vmem:[#allocation2 + $0x60] ss:$8 sps:$4 sm:$0xff]   ;;  %981 = vmatprep.subr.bf16.mxu1 %v3836_v2  ;;  %v3842_v6 = vld [vmem:[#allocation2 + $0x164] ss:$8 sps:$4 sm:$0xff]   ;;  %v3845_v8 = vld [vmem:[#allocation2 + $0x54] ss:$8 sps:$4 sm:$0xff]  }
  0x2e   : > { %982 = vmatpush1.bf16.msra.mxu1 %v3838_v3  ;;  %940 = vmatprep.subr.bf16.mxu0 %v3839_v4  ;;  %v3844_v7 = vld [vmem:[#allocation2 + $0x160] ss:$8 sps:$4 sm:$0xff]   ;;  %v3847_v9 = vld [vmem:[#allocation2 + $0x50] ss:$8 sps:$4 sm:$0xff]   ;;  %v3848_v10 = vld [vmem:[#allocation2 + $0x154] ss:$8 sps:$4 sm:$0xff]  }
  0x2f   : > { %983 = vmatprep.subr.bf16.mxu1 %v3842_v6  ;;  %v3851_v11 = vld [vmem:[#allocation2 + $0x44] ss:$8 sps:$4 sm:$0xff]   ;;  %v3850_v12 = vld [vmem:[#allocation2 + $0x150] ss:$8 sps:$4 sm:$0xff]   ;;  %v3853_v14 = vld [vmem:[#allocation2 + $0x40] ss:$8 sps:$4 sm:$0xff]  }
  0x30   : > { %v3854_v13 = vld [vmem:[#allocation2 + $0x144] ss:$8 sps:$4 sm:$0xff]   ;;  %v3857_v15 = vld [vmem:[#allocation2 + $0x34] ss:$8 sps:$4 sm:$0xff]   ;;  %v3856_v16 = vld [vmem:[#allocation2 + $0x140] ss:$8 sps:$4 sm:$0xff]  }
  0x31   : > { %941 = vmatpush1.bf16.msra.mxu0 %v3841_v5  ;;  %v3860_v17 = vld [vmem:[#allocation2 + $0x134] ss:$8 sps:$4 sm:$0xff]   ;;  %v3859_v18 = vld [vmem:[#allocation2 + $0x30] ss:$8 sps:$4 sm:$0xff]   ;;  %v3863_v19 = vld [vmem:[#allocation2 + $0x24] ss:$8 sps:$4 sm:$0xff]  }
  0x32   : > { %942 = vmatprep.subr.bf16.mxu0 %v3845_v8  ;;  %984 = vmatpush1.bf16.msra.mxu1 %v3844_v7  ;;  %v3862_v20 = vld [vmem:[#allocation2 + $0x130] ss:$8 sps:$4 sm:$0xff]   ;;  %v3866_v21 = vld [vmem:[#allocation2 + $0x124] ss:$8 sps:$4 sm:$0xff]   ;;  %v3865_v22 = vld [vmem:[#allocation2 + $0x20] ss:$8 sps:$4 sm:$0xff]  }
  0x33   : > { %985 = vmatprep.subr.bf16.mxu1 %v3848_v10  ;;  %v3869_v23 = vld [vmem:[#allocation2 + $0x14] ss:$8 sps:$4 sm:$0xff]   ;;  %v3868_v24 = vld [vmem:[#allocation2 + $0x120] ss:$8 sps:$4 sm:$0xff]   ;;  %v3871_v26 = vld [vmem:[#allocation2 + $0x10] ss:$8 sps:$4 sm:$0xff]  }
  0x34   : > { %v3872_v25 = vld [vmem:[#allocation2 + $0x114] ss:$8 sps:$4 sm:$0xff]   ;;  %v3875_v27 = vld [vmem:[#allocation2 + $0x4] ss:$8 sps:$4 sm:$0xff]   ;;  %v3874_v28 = vld [vmem:[#allocation2 + $0x110] ss:$8 sps:$4 sm:$0xff]  }
  0x35   : > { %943 = vmatpush1.bf16.msra.mxu0 %v3847_v9  ;;  %s3307_s16 = sshll.u32 %s3298_s24, 1  ;;  %v3878_v29 = vld [vmem:[#allocation2 + $0x104] ss:$8 sps:$4 sm:$0xff]   ;;  %v3877_v30 = vld [vmem:[#allocation2] ss:$8 sps:$4 sm:$0xff]   ;;  %vm4406_vm4 = vmmov 0  }
  0x36   : > { %944 = vmatprep.subr.bf16.mxu0 %v3851_v11  ;;  %986 = vmatpush1.bf16.msra.mxu1 %v3850_v12  ;;  %v3881_v31 = vld [vmem:[#allocation2 + $0xf4] ss:$8 sps:$4 sm:$0xff]   ;;  %p294_p2 = scmp.lt.s32.totalorder %s3307_s16, 3  ;;  %v3880_v32 = vld [vmem:[#allocation2 + $0x100] ss:$8 sps:$4 sm:$0xff]   ;;  %s4407_s14 = smov 1.0  }
  0x37   : > { %987 = vmatprep.subr.bf16.mxu1 %v3854_v13  ;;  %v3884_v33 = vld [vmem:[#allocation2 + $0x1f4] ss:$8 sps:$4 sm:$0xff]   ;;  %v3883_v34 = vld [vmem:[#allocation2 + $0xf0] ss:$8 sps:$4 sm:$0xff]   ;;  %v3887_v35 = vld [vmem:[#allocation2 + $0xe4] ss:$8 sps:$4 sm:$0xff]  }
  0x38   : > { %s4983_s16 = smov (!%p294_p2, %s3307_s16), 3  ;;  %v3886_v36 = vld [vmem:[#allocation2 + $0x1f0] ss:$8 sps:$4 sm:$0xff]   ;;  %v3890_v37 = vld [vmem:[#allocation2 + $0x1e4] ss:$8 sps:$4 sm:$0xff]  }
  0x39   : > { %945 = vmatpush1.bf16.msra.mxu0 %v3853_v14  ;;  %v3889_v38 = vld [vmem:[#allocation2 + $0xe0] ss:$8 sps:$4 sm:$0xff]   ;;  %v3893_v39 = vld [vmem:[#allocation2 + $0xd4] ss:$8 sps:$4 sm:$0xff]   ;;  %s3725_s17 = smul.u32 24, %s4983_s16  ;;  %s3312_s23 = sshll.u32 %s4983_s16, 3 }
  0x3a   : > { %946 = vmatprep.subr.bf16.mxu0 %v3857_v15  ;;  %988 = vmatpush1.bf16.msra.mxu1 %v3856_v16  ;;  %v3892_v40 = vld [vmem:[#allocation2 + $0x1e0] ss:$8 sps:$4 sm:$0xff]   ;;  %v3896_v41 = vld [vmem:[#allocation2 + $0x1d4] ss:$8 sps:$4 sm:$0xff]   ;;  %v3895_v42 = vld [vmem:[#allocation2 + $0xd0] ss:$8 sps:$4 sm:$0xff]   ;;  %s311_s28 = scalar_lea.vmem %s4978_s6, %s3312_s23 }
  0x3b   : > { %989 = vmatprep.subr.bf16.mxu1 %v3860_v17  ;;  %v3899_v43 = vld [vmem:[#allocation2 + $0xc4] ss:$8 sps:$4 sm:$0xff]   ;;  %s4507_s20 = scalar_lea.vmem %s4972_s0, %s3725_s17  ;;  %v3898_v44 = vld [vmem:[#allocation2 + $0x1d0] ss:$8 sps:$4 sm:$0xff]   ;;  %v3901_v46 = vld [vmem:[#allocation2 + $0xc0] ss:$8 sps:$4 sm:$0xff]   ;;  %s4649_s15 = scalar_lea.vmem %s4973_s1, %s3725_s17 }
  0x3c   : > { %v3902_v45 = vld [vmem:[#allocation2 + $0x1c4] ss:$8 sps:$4 sm:$0xff]   ;;  %v3905_v48 = vld [vmem:[#allocation2 + $0xb4] ss:$8 sps:$4 sm:$0xff]   ;;  %v3904_v49 = vld [vmem:[#allocation2 + $0x1c0] ss:$8 sps:$4 sm:$0xff]  }
  0x3d   : > { %947 = vmatpush1.bf16.msra.mxu0 %v3859_v18  ;;  %v3930_v47 = vld [vmem:[%s4507_s20 + $0x4] ss:$24 sps:$4 sm:$0xff]   ;;  %v3907_v52 = vld [vmem:[#allocation2 + $0xb0] ss:$8 sps:$4 sm:$0xff]   ;;  %v3913_v56 = vld [vmem:[#allocation2 + $0xa0] ss:$8 sps:$4 sm:$0xff]  }
  0x3e   : > { %948 = vmatprep.subr.bf16.mxu0 %v3863_v19  ;;  %990 = vmatpush1.bf16.msra.mxu1 %v3862_v20  ;;  %v3908_v50 = vld [vmem:[#allocation2 + $0x1b4] ss:$8 sps:$4 sm:$0xff]   ;;  %v3937_v51 = vld [vmem:[%s4507_s20 + $0xc] ss:$24 sps:$4 sm:$0xff]   ;;  %v3910_v54 = vld [vmem:[#allocation2 + $0x1b0] ss:$8 sps:$4 sm:$0xff]  }
  0x3f   : > { %991 = vmatprep.subr.bf16.mxu1 %v3866_v21  ;;  %970 = vmatprep.mubr.bf16.mxu0 %v3930_v47  ;;  %v3911_v53 = vld [vmem:[#allocation2 + $0xa4] ss:$8 sps:$4 sm:$0xff]   ;;  %v3917_v57 = vld [vmem:[#allocation2 + $0x94] ss:$8 sps:$4 sm:$0xff]   ;;  %v3916_v58 = vld [vmem:[#allocation2 + $0x1a0] ss:$8 sps:$4 sm:$0xff]  }
  0x40   : > { %1013 = vmatprep.mubr.bf16.mxu1 %v3937_v51  ;;  %v3914_v55 = vld [vmem:[#allocation2 + $0x1a4] ss:$8 sps:$4 sm:$0xff]   ;;  %v3920_v59 = vld [vmem:[#allocation2 + $0x194] ss:$8 sps:$4 sm:$0xff]   ;;  %v3919_v60 = vld [vmem:[#allocation2 + $0x90] ss:$8 sps:$4 sm:$0xff]  }
  0x41   : > { %949 = vmatpush1.bf16.msra.mxu0 %v3865_v22  ;;  %v3923_v61 = vld [vmem:[#allocation2 + $0x84] ss:$8 sps:$4 sm:$0xff]   ;;  %v3922_v62 = vld [vmem:[#allocation2 + $0x190] ss:$8 sps:$4 sm:$0xff]   ;;  %v3925_v0 = vld [vmem:[#allocation2 + $0x80] ss:$8 sps:$4 sm:$0xff]  }
  0x42   : > { %950 = vmatprep.subr.bf16.mxu0 %v3869_v23  ;;  %992 = vmatpush1.bf16.msra.mxu1 %v3868_v24  ;;  %v3926_v63 = vld [vmem:[#allocation2 + $0x184] ss:$8 sps:$4 sm:$0xff]   ;;  %v3934_v1 = vld [vmem:[#allocation2 + $0x274] ss:$8 sps:$4 sm:$0xff]   ;;  %v3931_v2 = vld [vmem:[#allocation2 + $0x180] ss:$8 sps:$4 sm:$0xff]  }
  0x43   : > { %993 = vmatprep.subr.bf16.mxu1 %v3872_v25  ;;  %v3928_v3 = vld [vmem:[%s4507_s20] ss:$24 sps:$4 sm:$0xff]   ;;  %v3940_v6 = vld [vmem:[#allocation2 + $0x264] ss:$8 sps:$4 sm:$0xff]   ;;  %v3943_v9 = vld [vmem:[#allocation2 + $0x254] ss:$8 sps:$4 sm:$0xff]  }
  0x44   : > { %v3932_v4 = vld [vmem:[#allocation2 + $0x270] ss:$8 sps:$4 sm:$0xff]   ;;  %v3935_v5 = vld [vmem:[%s4507_s20 + $0x8] ss:$24 sps:$4 sm:$0xff]   ;;  %v3985_v8 = vld [vmem:[%s4507_s20 + $0x14] ss:$24 sps:$4 sm:$0xff]  }
  0x45   : > { %951 = vmatpush1.bf16.msra.mxu0 %v3871_v26  ;;  %v3938_v7 = vld [vmem:[#allocation2 + $0x260] ss:$8 sps:$4 sm:$0xff]   ;;  %v3941_v10 = vld [vmem:[#allocation2 + $0x250] ss:$8 sps:$4 sm:$0xff]   ;;  %v3946_v11 = vld [vmem:[#allocation2 + $0x244] ss:$8 sps:$4 sm:$0xff]  }
  0x46   : > { %952 = vmatprep.subr.bf16.mxu0 %v3875_v27  ;;  %994 = vmatpush1.bf16.msra.mxu1 %v3874_v28  ;;  %v3944_v12 = vld [vmem:[#allocation2 + $0x240] ss:$8 sps:$4 sm:$0xff]   ;;  %v3949_v13 = vld [vmem:[#allocation2 + $0x234] ss:$8 sps:$4 sm:$0xff]   ;;  %v3947_v14 = vld [vmem:[#allocation2 + $0x230] ss:$8 sps:$4 sm:$0xff]  }
  0x47   : > { %995 = vmatprep.subr.bf16.mxu1 %v3878_v29  ;;  %v3952_v15 = vld [vmem:[#allocation2 + $0x224] ss:$8 sps:$4 sm:$0xff]   ;;  %v3950_v16 = vld [vmem:[#allocation2 + $0x220] ss:$8 sps:$4 sm:$0xff]   ;;  %v3955_v17 = vld [vmem:[#allocation2 + $0x214] ss:$8 sps:$4 sm:$0xff]  }
  0x48   : > { %v3953_v18 = vld [vmem:[#allocation2 + $0x210] ss:$8 sps:$4 sm:$0xff]   ;;  %v3958_v19 = vld [vmem:[#allocation2 + $0x204] ss:$8 sps:$4 sm:$0xff]   ;;  %v3956_v20 = vld [vmem:[#allocation2 + $0x200] ss:$8 sps:$4 sm:$0xff]  }
  0x49   : > { %953 = vmatpush1.bf16.msra.mxu0 %v3877_v30  ;;  %v3961_v21 = vld [vmem:[#allocation2 + $0x2f4] ss:$8 sps:$4 sm:$0xff]   ;;  %v3959_v22 = vld [vmem:[#allocation2 + $0x2f0] ss:$8 sps:$4 sm:$0xff]   ;;  %v3964_v23 = vld [vmem:[#allocation2 + $0x2e4] ss:$8 sps:$4 sm:$0xff]  }
  0x4a   : > { %954 = vmatprep.subr.bf16.mxu0 %v3881_v31  ;;  %996 = vmatpush1.bf16.msra.mxu1 %v3880_v32  ;;  %v3962_v24 = vld [vmem:[#allocation2 + $0x2e0] ss:$8 sps:$4 sm:$0xff]   ;;  %v3967_v25 = vld [vmem:[#allocation2 + $0x2d4] ss:$8 sps:$4 sm:$0xff]   ;;  %v3965_v26 = vld [vmem:[#allocation2 + $0x2d0] ss:$8 sps:$4 sm:$0xff]  }
  0x4b   : > { %997 = vmatprep.subr.bf16.mxu1 %v3884_v33  ;;  %v3970_v27 = vld [vmem:[#allocation2 + $0x2c4] ss:$8 sps:$4 sm:$0xff]   ;;  %v3968_v28 = vld [vmem:[#allocation2 + $0x2c0] ss:$8 sps:$4 sm:$0xff]   ;;  %v3973_v29 = vld [vmem:[#allocation2 + $0x2b4] ss:$8 sps:$4 sm:$0xff]  }
  0x4c   : > { %v3971_v30 = vld [vmem:[#allocation2 + $0x2b0] ss:$8 sps:$4 sm:$0xff]   ;;  %v3976_v31 = vld [vmem:[#allocation2 + $0x2a4] ss:$8 sps:$4 sm:$0xff]   ;;  %v3974_v32 = vld [vmem:[#allocation2 + $0x2a0] ss:$8 sps:$4 sm:$0xff]  }
  0x4d   : > { %955 = vmatpush2.bf16.msra.mxu0 %v3883_v34  ;;  %v3979_v33 = vld [vmem:[#allocation2 + $0x294] ss:$8 sps:$4 sm:$0xff]   ;;  %v3977_v34 = vld [vmem:[#allocation2 + $0x290] ss:$8 sps:$4 sm:$0xff]   ;;  %v3998_v47 = vld [vmem:[%s4975_s3 + $0xa8] ss:$28 sps:$4 sm:$0xff]  }
  0x4e   : > { %956 = vmatprep.subr.bf16.mxu0 %v3887_v35  ;;  %998 = vmatpush2.bf16.msra.mxu1 %v3886_v36  ;;  %v3982_v35 = vld [vmem:[#allocation2 + $0x284] ss:$8 sps:$4 sm:$0xff]   ;;  %v3980_v36 = vld [vmem:[#allocation2 + $0x280] ss:$8 sps:$4 sm:$0xff]   ;;  %v4004_v51 = vld [vmem:[%s4975_s3 + $0x38] ss:$28 sps:$4 sm:$0xff]  }
  0x4f   : > { %999 = vmatprep.subr.bf16.mxu1 %v3890_v37  ;;  %v3983_v37 = vld [vmem:[%s4507_s20 + $0x10] ss:$24 sps:$4 sm:$0xff]  }
  0x51   : > { %957 = vmatpush2.bf16.msra.mxu0 %v3889_v38  ;;  %v3986_v38 = vld [vmem:[%s4975_s3 + $0x188] ss:$28 sps:$4 sm:$0xff]  }
  0x52   : > { %958 = vmatprep.subr.bf16.mxu0 %v3893_v39  ;;  %1000 = vmatpush2.bf16.msra.mxu1 %v3892_v40  ;;  %v3988_v39 = vld [vmem:[%s4975_s3 + $0x18c] ss:$28 sps:$4 sm:$0xff]   ;;  %v3991_v40 = vld [vmem:[%s4975_s3 + $0x154] ss:$28 sps:$4 sm:$0xff]  }
  0x53   : > { %1001 = vmatprep.subr.bf16.mxu1 %v3896_v41  ;;  %v3989_v41 = vld [vmem:[%s4975_s3 + $0x150] ss:$28 sps:$4 sm:$0xff]  }
  0x55   : > { %959 = vmatpush2.bf16.msra.mxu0 %v3895_v42  ;;  %v3994_v42 = vld [vmem:[%s4975_s3 + $0x11c] ss:$28 sps:$4 sm:$0xff]  }
  0x56   : > { %960 = vmatprep.subr.bf16.mxu0 %v3899_v43  ;;  %1002 = vmatpush2.bf16.msra.mxu1 %v3898_v44  ;;  %v3992_v43 = vld [vmem:[%s4975_s3 + $0x118] ss:$28 sps:$4 sm:$0xff]   ;;  %v3997_v44 = vld [vmem:[%s4975_s3 + $0xe4] ss:$28 sps:$4 sm:$0xff]  }
  0x57   : > { %1003 = vmatprep.subr.bf16.mxu1 %v3902_v45  ;;  %v3995_v45 = vld [vmem:[%s4975_s3 + $0xe0] ss:$28 sps:$4 sm:$0xff]  }
  0x59   : > { %961 = vmatpush2.bf16.msra.mxu0 %v3901_v46  ;;  %v4000_v46 = vld [vmem:[%s4975_s3 + $0xac] ss:$28 sps:$4 sm:$0xff]  }
  0x5a   : > { %962 = vmatprep.subr.bf16.mxu0 %v3905_v48  ;;  %1004 = vmatpush2.bf16.msra.mxu1 %v3904_v49  ;;  %v4003_v48 = vld [vmem:[%s4975_s3 + $0x74] ss:$28 sps:$4 sm:$0xff]  }
  0x5b   : > { %1005 = vmatprep.subr.bf16.mxu1 %v3908_v50  ;;  %v4001_v49 = vld [vmem:[%s4975_s3 + $0x70] ss:$28 sps:$4 sm:$0xff]   ;;  %v4006_v50 = vld [vmem:[%s4975_s3 + $0x3c] ss:$28 sps:$4 sm:$0xff]  }
  0x5d   : > { %963 = vmatpush2.bf16.msra.mxu0 %v3907_v52  ;;  %v4009_v52 = vld [vmem:[%s4975_s3 + $0x4] ss:$28 sps:$4 sm:$0xff]  }
  0x5e   : > { %964 = vmatprep.subr.bf16.mxu0 %v3911_v53  ;;  %1006 = vmatpush2.bf16.msra.mxu1 %v3910_v54  ;;  %v4007_v53 = vld [vmem:[%s4975_s3] ss:$28 sps:$4 sm:$0xff]   ;;  %v4012_v54 = vld [vmem:[%s4975_s3 + $0x34c] ss:$28 sps:$4 sm:$0xff]  }
  0x5f   : > { %1007 = vmatprep.subr.bf16.mxu1 %v3914_v55  ;;  %v4010_v55 = vld [vmem:[%s4975_s3 + $0x348] ss:$28 sps:$4 sm:$0xff]  }
  0x61   : > { %965 = vmatpush2.bf16.msra.mxu0 %v3913_v56  ;;  %v4015_v56 = vld [vmem:[%s4975_s3 + $0x314] ss:$28 sps:$4 sm:$0xff]  }
  0x62   : > { %966 = vmatprep.subr.bf16.mxu0 %v3917_v57  ;;  %1008 = vmatpush2.bf16.msra.mxu1 %v3916_v58  ;;  %v4013_v57 = vld [vmem:[%s4975_s3 + $0x310] ss:$28 sps:$4 sm:$0xff]   ;;  %v4018_v58 = vld [vmem:[%s4975_s3 + $0x2dc] ss:$28 sps:$4 sm:$0xff]  }
  0x63   : > { %1009 = vmatprep.subr.bf16.mxu1 %v3920_v59  ;;  %v4016_v59 = vld [vmem:[%s4975_s3 + $0x2d8] ss:$28 sps:$4 sm:$0xff]  }
  0x65   : > { %967 = vmatpush2.bf16.msra.mxu0 %v3919_v60  ;;  %v4021_v60 = vld [vmem:[%s4975_s3 + $0x2a4] ss:$28 sps:$4 sm:$0xff]  }
  0x66   : > { %968 = vmatprep.subr.bf16.mxu0 %v3923_v61  ;;  %1010 = vmatpush2.bf16.msra.mxu1 %v3922_v62  ;;  %v4019_v61 = vld [vmem:[%s4975_s3 + $0x2a0] ss:$28 sps:$4 sm:$0xff]   ;;  %v4024_v62 = vld [vmem:[%s4975_s3 + $0x26c] ss:$28 sps:$4 sm:$0xff]  }
  0x67   : > { %1011 = vmatprep.subr.bf16.mxu1 %v3926_v63  ;;  %v4022_v63 = vld [vmem:[%s4975_s3 + $0x268] ss:$28 sps:$4 sm:$0xff]  }
  0x69   : > { %969 = vmatpush2.bf16.msra.mxu0 %v3925_v0  ;;  %v4027_v0 = vld [vmem:[%s4975_s3 + $0x234] ss:$28 sps:$4 sm:$0xff]  }
  0x6a   : > { %1024 = vmatprep.subr.bf16.mxu0 %v3934_v1  ;;  %1012 = vmatpush2.bf16.msra.mxu1 %v3931_v2  ;;  %v4025_v1 = vld [vmem:[%s4975_s3 + $0x230] ss:$28 sps:$4 sm:$0xff]   ;;  %v4030_v2 = vld [vmem:[%s4975_s3 + $0x1fc] ss:$28 sps:$4 sm:$0xff]  }
  0x6b   : > { %1269 = vmatprep.subr.bf16.mxu1 %v3988_v39 }
  0x6c   : > { %971 = vmatmul.mubr.bf16.vlgmr.msra.gmra.mxu0 %v3928_v3  ;;  %v4028_v3 = vld [vmem:[%s4975_s3 + $0x1f8] ss:$28 sps:$4 sm:$0xff]  }
  0x6d   : > { %1025 = vmatpush1.bf16.msra.mxu0 %v3932_v4  ;;  %1014 = vmatmul.mubr.bf16.vlgmr.msra.gmra.mxu1 %v3935_v5  ;;  %v4033_v4 = vld [vmem:[%s4975_s3 + $0x1c4] ss:$28 sps:$4 sm:$0xff]  }
  0x6e   : > { %1026 = vmatprep.subr.bf16.mxu0 %v3940_v6  ;;  %1056 = vmatprep.mubr.bf16.mxu0 %v3985_v8  ;;  %v4031_v5 = vld [vmem:[%s4975_s3 + $0x1c0] ss:$28 sps:$4 sm:$0xff]   ;;  %v4034_v6 = vld [vmem:[#allocation4 + $0x268] ss:$44 sps:$4 sm:$0xff]  }
  0x6f   : > { %1270 = vmatpush1.bf16.msra.mxu1 %v3986_v38  ;;  %v4039_v8 = vld [vmem:[#allocation4 + $0x214] ss:$44 sps:$4 sm:$0xff]  }
  0x70   : > { %1271 = vmatprep.subr.bf16.mxu1 %v3991_v40 }
  0x71   : > { %1027 = vmatpush1.bf16.msra.mxu0 %v3938_v7  ;;  %v4036_v7 = vld [vmem:[#allocation4 + $0x26c] ss:$44 sps:$4 sm:$0xff]  }
  0x72   : > { %1028 = vmatprep.subr.bf16.mxu0 %v3943_v9  ;;  %v4037_v9 = vld [vmem:[#allocation4 + $0x210] ss:$44 sps:$4 sm:$0xff]  }
  0x73   : > { %1272 = vmatpush1.bf16.msra.mxu1 %v3989_v41 }
  0x74   : > { %1273 = vmatprep.subr.bf16.mxu1 %v3994_v42 }
  0x75   : > { %1029 = vmatpush1.bf16.msra.mxu0 %v3941_v10  ;;  %v4042_v10 = vld [vmem:[#allocation4 + $0x1bc] ss:$44 sps:$4 sm:$0xff]  }
  0x76   : > { %1030 = vmatprep.subr.bf16.mxu0 %v3946_v11  ;;  %v4040_v11 = vld [vmem:[#allocation4 + $0x1b8] ss:$44 sps:$4 sm:$0xff]  }
  0x77   : > { %1274 = vmatpush1.bf16.msra.mxu1 %v3992_v43 }
  0x78   : > { %1275 = vmatprep.subr.bf16.mxu1 %v3997_v44 }
  0x79   : > { %1031 = vmatpush1.bf16.msra.mxu0 %v3944_v12  ;;  %v4045_v12 = vld [vmem:[#allocation4 + $0x164] ss:$44 sps:$4 sm:$0xff]  }
  0x7a   : > { %1032 = vmatprep.subr.bf16.mxu0 %v3949_v13  ;;  %v4043_v13 = vld [vmem:[#allocation4 + $0x160] ss:$44 sps:$4 sm:$0xff]  }
  0x7b   : > { %1276 = vmatpush1.bf16.msra.mxu1 %v3995_v45 }
  0x7c   : > { %1277 = vmatprep.subr.bf16.mxu1 %v4000_v46 }
  0x7d   : > { %1033 = vmatpush1.bf16.msra.mxu0 %v3947_v14  ;;  %v4048_v14 = vld [vmem:[#allocation4 + $0x10c] ss:$44 sps:$4 sm:$0xff]  }
  0x7e   : > { %1034 = vmatprep.subr.bf16.mxu0 %v3952_v15  ;;  %v4046_v15 = vld [vmem:[#allocation4 + $0x108] ss:$44 sps:$4 sm:$0xff]  }
  0x7f   : > { %1278 = vmatpush1.bf16.msra.mxu1 %v3998_v47 }
  0x80   : > { %1279 = vmatprep.subr.bf16.mxu1 %v4003_v48 }
  0x81   : > { %1035 = vmatpush1.bf16.msra.mxu0 %v3950_v16  ;;  %v418_v16 = vlaneseq }
  0x82   : > { %1036 = vmatprep.subr.bf16.mxu0 %v3955_v17 }
  0x83   : > { %1280 = vmatpush1.bf16.msra.mxu1 %v4001_v49  ;;  %v4051_v49 = vld [vmem:[#allocation4 + $0xb4] ss:$44 sps:$4 sm:$0xff]  }
  0x84   : > { %1281 = vmatprep.subr.bf16.mxu1 %v4006_v50  ;;  %v4049_v50 = vld [vmem:[#allocation4 + $0xb0] ss:$44 sps:$4 sm:$0xff]  }
  0x85   : > { %1037 = vmatpush1.bf16.msra.mxu0 %v3953_v18  ;;  %v4612_v18 = vshrl.u32 %v418_v16, 7 }
  0x86   : > { %1038 = vmatprep.subr.bf16.mxu0 %v3958_v19 }
  0x87   : > { %1282 = vmatpush1.bf16.msra.mxu1 %v4004_v51  ;;  %v4054_v51 = vld [vmem:[#allocation4 + $0x5c] ss:$44 sps:$4 sm:$0xff]  }
  0x88   : > { %1283 = vmatprep.subr.bf16.mxu1 %v4009_v52  ;;  %v4052_v52 = vld [vmem:[#allocation4 + $0x58] ss:$44 sps:$4 sm:$0xff]  }
  0x89   : > { %1039 = vmatpush1.bf16.msra.mxu0 %v3956_v20 }
  0x8a   : > { %1040 = vmatprep.subr.bf16.mxu0 %v3961_v21  ;;  %v4615_v21 = vsub.s32 1, %v4612_v18 }
  0x8b   : > { %1284 = vmatpush1.bf16.msra.mxu1 %v4007_v53  ;;  %v4057_v53 = vld [vmem:[#allocation4 + $0x4] ss:$44 sps:$4 sm:$0xff]  }
  0x8c   : > { %1285 = vmatprep.subr.bf16.mxu1 %v4012_v54  ;;  %v4055_v54 = vld [vmem:[#allocation4] ss:$44 sps:$4 sm:$0xff]  }
  0x8d   : > { %1041 = vmatpush2.bf16.msra.mxu0 %v3959_v22  ;;  %v416_v22 = vld [vmem:[%s4977_s5] sm:$0x3] }
  0x8e   : > { %1042 = vmatprep.subr.bf16.mxu0 %v3964_v23  ;;  %v4621_v23 = vsub.s32 0, %v4612_v18 }
  0x8f   : > { %1286 = vmatpush2.bf16.msra.mxu1 %v4010_v55  ;;  %v4404_v55 = vmov 0  }
  0x90   : > { %1287 = vmatprep.subr.bf16.mxu1 %v4015_v56  ;;  %v4058_v56 = vld [vmem:[%s4975_s3 + $0x350] ss:$28 sps:$4 sm:$0xff]  }
  0x91   : > { %1043 = vmatpush2.bf16.msra.mxu0 %v3962_v24 }
  0x92   : > { %1044 = vmatprep.subr.bf16.mxu0 %v3967_v25 }
  0x93   : > { %1288 = vmatpush2.bf16.msra.mxu1 %v4013_v57  ;;  %v4059_v57 = vld [vmem:[%s4975_s3 + $0x190] ss:$28 sps:$4 sm:$0xff]  }
  0x94   : > { %1289 = vmatprep.subr.bf16.mxu1 %v4018_v58  ;;  %v4060_v58 = vld [vmem:[%s4975_s3 + $0x318] ss:$28 sps:$4 sm:$0xff]  }
  0x95   : > { %1045 = vmatpush2.bf16.msra.mxu0 %v3965_v26  ;;  %v425_v26 = vrot.slane %v416_v22, %v4615_v21 }
  0x96   : > { %1046 = vmatprep.subr.bf16.mxu0 %v3970_v27  ;;  %v421_v27 = vrot.slane %v416_v22, %v4621_v23 }
  0x97   : > { %1290 = vmatpush2.bf16.msra.mxu1 %v4016_v59  ;;  %v4061_v59 = vld [vmem:[%s4975_s3 + $0x158] ss:$28 sps:$4 sm:$0xff]  }
  0x98   : > { %1291 = vmatprep.subr.bf16.mxu1 %v4021_v60  ;;  %v4062_v60 = vld [vmem:[%s4975_s3 + $0x2e0] ss:$28 sps:$4 sm:$0xff]  }
  0x99   : > { %1047 = vmatpush2.bf16.msra.mxu0 %v3968_v28 }
  0x9a   : > { %1048 = vmatprep.subr.bf16.mxu0 %v3973_v29 }
  0x9b   : > { %1292 = vmatpush2.bf16.msra.mxu1 %v4019_v61  ;;  %v4063_v61 = vld [vmem:[%s4975_s3 + $0x120] ss:$28 sps:$4 sm:$0xff]  }
  0x9c   : > { %1293 = vmatprep.subr.bf16.mxu1 %v4024_v62  ;;  %v1067_v62 = vld [vmem:[%s4649_s15 + $0x10] sm:$0xff] }
  0x9d   : > { %1049 = vmatpush2.bf16.msra.mxu0 %v3971_v30  ;;  %4258 = vlog2.f32 %v1067_v62 }
  0x9e   : > { %1050 = vmatprep.subr.bf16.mxu0 %v3976_v31 }
  0x9f   : > { %1294 = vmatpush2.bf16.msra.mxu1 %v4022_v63  ;;  %v1068_v63 = vld [vmem:[%s4649_s15 + $0x28] sm:$0xff] }
  0xa0   : > { %1295 = vmatprep.subr.bf16.mxu1 %v4027_v0  ;;  %4260 = vlog2.f32 %v1068_v63 }
  0xa1   : > { %1051 = vmatpush2.bf16.msra.mxu0 %v3974_v32 }
  0xa2   : > { %1052 = vmatprep.subr.bf16.mxu0 %v3979_v33 }
  0xa3   : > { %1296 = vmatpush2.bf16.msra.mxu1 %v4025_v1 }
  0xa4   : > { %1297 = vmatprep.subr.bf16.mxu1 %v4030_v2 }
  0xa5   : > { %1053 = vmatpush2.bf16.msra.mxu0 %v3977_v34 }
  0xa6   : > { %1054 = vmatprep.subr.bf16.mxu0 %v3982_v35 }
  0xa7   : > { %1298 = vmatpush2.bf16.msra.mxu1 %v4028_v3 }
  0xa8   : > { %1299 = vmatprep.subr.bf16.mxu1 %v4033_v4 }
  0xa9   : > { %1055 = vmatpush2.bf16.msra.mxu0 %v3980_v36 }
  0xaa   : > { %1454 = vmatprep.subr.bf16.mxu0 %v4036_v7  ;;  %v4259_v0 = vpop.eup %4258 }
  0xab   : > { %1300 = vmatpush2.bf16.msra.mxu1 %v4031_v5  ;;  %v1070_v1 = vmul.f32 0.6931472, %v4259_v0  ;;  %v3447_v5 = vld [vmem:[%s4977_s5 + $0x14] ss:$0 sm:$0xff] }
  0xac   : > { %1057 = vmatmul.mubr.bf16.vlgmr.msra.gmra.mxu0 %v3983_v37  ;;  %3630 = vmatprep.subr.bf16.mxu1 %v4058_v56 }
  0xad   : > { %1455 = vmatpush1.bf16.msra.mxu0 %v4034_v6  ;;  %1486 = vmatprep.mubr.bf16.mxu0 %v4404_v55  ;;  %v4261_v2 = vpop.eup %4260  ;;  %v1073_v3 = vsub.f32 0.0, %v1070_v1 }
  0xae   : > { %1456 = vmatprep.subr.bf16.mxu0 %v4039_v8  ;;  %v1072_v4 = vmul.f32 0.6931472, %v4261_v2 }
  0xaf   : > { %v1319_v6 = vmul.f32 %v3447_v5, %v1073_v3 }
  0xb0   : > { %v1074_v7 = vsub.f32 0.0, %v1072_v4 }
  0xb1   : > { %1457 = vmatpush1.bf16.msra.mxu0 %v4037_v9 }
  0xb2   : > { %1458 = vmatprep.subr.bf16.mxu0 %v4042_v10  ;;  %v1320_v10 = vmul.f32 %v3447_v5, %v1074_v7 }
  0xb5   : > { %1459 = vmatpush1.bf16.msra.mxu0 %v4040_v11  ;;  %v3448_v11 = vld [vmem:[%s4977_s5 + $0x2] ss:$0 sm:$0xff] }
  0xb6   : > { %1460 = vmatprep.subr.bf16.mxu0 %v4045_v12 }
  0xb9   : > { %1461 = vmatpush1.bf16.msra.mxu0 %v4043_v13 }
  0xba   : > { %1462 = vmatprep.subr.bf16.mxu0 %v4048_v14 }
  0xbd   : > { %1463 = vmatpush1.bf16.msra.mxu0 %v4046_v15 }
  0xbe   : > { %1464 = vmatprep.subr.bf16.mxu0 %v4051_v49 }
  0xc1   : > { %1465 = vmatpush1.bf16.msra.mxu0 %v4049_v50 }
  0xc2   : > { %1466 = vmatprep.subr.bf16.mxu0 %v4054_v51 }
  0xc5   : > { %1467 = vmatpush1.bf16.msra.mxu0 %v4052_v52 }
  0xc6   : > { %1468 = vmatprep.subr.bf16.mxu0 %v4057_v53 }
  0xc9   : > { %1469 = vmatpush1.bf16.msra.mxu0 %v4055_v54 }
 0x12c   : > { %v972_v17 = vpop.f32.mrf.mxu0 }
 0x12d   : > { %v1015_v20 = vpop.f32.mrf.mxu1  ;;  %v973_v34 = vadd.f32 %v972_v17, %v421_v27 }
 0x12e   : > { %v974_v19 = vpop.f32.mrf.mxu0 }
 0x12f   : > { %v1017_v25 = vpop.f32.mrf.mxu1  ;;  %v975_v32 = vadd.f32 %v974_v19, %v425_v26  ;;  %v1016_v41 = vadd.f32 %v1015_v20, %v973_v34  ;;  %v4074_v34 = vld [vmem:[#allocation4 + $0x270] ss:$44 sps:$4 sm:$0xff]  }
 0x130   : > { %v976_v24 = vpop.f32.mrf.mxu0 }
 0x131   : > { %v1019_v29 = vpop.f32.mrf.mxu1  ;;  %v977_v30 = vadd.f32 %v976_v24, %v421_v27  ;;  %v1018_v39 = vadd.f32 %v1017_v25, %v975_v32  ;;  %v4064_v24 = vld [vmem:[%s4975_s3 + $0x2a8] ss:$28 sps:$4 sm:$0xff]   ;;  %v4067_v27 = vld [vmem:[%s4975_s3 + $0xb0] ss:$28 sps:$4 sm:$0xff]  }
 0x132   : > { %v978_v28 = vpop.f32.mrf.mxu0  ;;  %v4065_v25 = vld [vmem:[%s4975_s3 + $0xe8] ss:$28 sps:$4 sm:$0xff]  }
 0x133   : > { %v979_v33 = vadd.f32 %v978_v28, %v425_v26  ;;  %v1021_v35 = vpop.f32.mrf.mxu1  ;;  %v1020_v37 = vadd.f32 %v1019_v29, %v977_v30  ;;  %v4066_v26 = vld [vmem:[%s4975_s3 + $0x270] ss:$28 sps:$4 sm:$0xff]   ;;  %v4068_v28 = vld [vmem:[%s4975_s3 + $0x238] ss:$28 sps:$4 sm:$0xff]   ;;  %v4070_v30 = vld [vmem:[%s4975_s3 + $0x200] ss:$28 sps:$4 sm:$0xff]  }
 0x134   : > { %v4069_v29 = vld [vmem:[%s4975_s3 + $0x78] ss:$28 sps:$4 sm:$0xff]   ;;  %v4072_v32 = vld [vmem:[%s4975_s3 + $0x1c8] ss:$28 sps:$4 sm:$0xff]  }
 0x135   : > { %v1022_v40 = vadd.f32 %v1021_v35, %v979_v33  ;;  %v4073_v33 = vld [vmem:[%s4975_s3 + $0x8] ss:$28 sps:$4 sm:$0xff]   ;;  %v4076_v35 = vld [vmem:[#allocation4 + $0x274] ss:$44 sps:$4 sm:$0xff]  }
 0x136   : > { %1896 = vmatprep.subr.bf16.mxu0 %v4076_v35  ;;  %v4103_v35 = vld [vmem:[#allocation4 + $0x11c] ss:$44 sps:$4 sm:$0xff]  }
 0x16c   : > { %v1058_v31 = vpop.f32.mrf.mxu0 }
 0x16d   : > { %v1059_v46 = vadd.f32 %v1058_v31, %v1016_v41  ;;  %v4071_v31 = vld [vmem:[%s4975_s3 + $0x40] ss:$28 sps:$4 sm:$0xff]   ;;  %v4094_v41 = vld [vmem:[#allocation4 + $0x16c] ss:$44 sps:$4 sm:$0xff]  }
 0x16e   : > { %v1060_v36 = vpop.f32.mrf.mxu0 }
 0x16f   : > { %v1061_v44 = vadd.f32 %v1060_v36, %v1018_v39  ;;  %v4079_v36 = vld [vmem:[#allocation4 + $0x27c] ss:$44 sps:$4 sm:$0xff]   ;;  %v4088_v39 = vld [vmem:[#allocation4 + $0x1c4] ss:$44 sps:$4 sm:$0xff]  }
 0x170   : > { %v1062_v38 = vpop.f32.mrf.mxu0 }
 0x171   : > { %v1063_v42 = vadd.f32 %v1062_v38, %v1020_v37  ;;  %v4082_v37 = vld [vmem:[#allocation4 + $0x21c] ss:$44 sps:$4 sm:$0xff]   ;;  %v4080_v38 = vld [vmem:[#allocation4 + $0x218] ss:$44 sps:$4 sm:$0xff]  }
 0x172   : > { %v1064_v43 = vpop.f32.mrf.mxu0 }
 0x173   : > { %v1065_v45 = vadd.f32 %v1064_v43, %v1022_v40  ;;  %v1107_v48 = vpack.c.bf16 %v1063_v42, %v1059_v46  ;;  %v4086_v40 = vld [vmem:[#allocation4 + $0x1c0] ss:$44 sps:$4 sm:$0xff]   ;;  %v4092_v42 = vld [vmem:[#allocation4 + $0x168] ss:$44 sps:$4 sm:$0xff]  }
 0x174   : > { %v4100_v43 = vld [vmem:[#allocation4 + $0x114] ss:$44 sps:$4 sm:$0xff]  }
 0x175   : > { %v1108_v47 = vpack.c.bf16 %v1065_v45, %v1061_v44  ;;  %v4098_v44 = vld [vmem:[#allocation4 + $0x110] ss:$44 sps:$4 sm:$0xff]   ;;  %v1362_v45 = vld [vmem:[%s4977_s5 + $0x3] sm:$0x3] }
 0x176   : > { %v1367_v46 = vrot.slane %v1362_v45, %v4621_v23 }
 0x177   : > { %1301 = vmatprep.mubr.bf16.mxu1 %v1108_v47  ;;  %v1371_v47 = vrot.slane %v1362_v45, %v4615_v21  ;;  %v4118_v45 = vld [vmem:[#allocation4 + $0xc] ss:$44 sps:$4 sm:$0xff]  }
 0x178   : > { %1302 = vmatmul.mubr.bf16.vlgmr.msra.gmra.mxu1 %v1107_v48 }
 0x179   : > { %3631 = vmatpush3.bf16.msra.mxu1 %v4059_v57 }
 0x17a   : > { %3632 = vmatprep.subr.bf16.mxu1 %v4060_v58 }
 0x17d   : > { %3633 = vmatpush3.bf16.msra.mxu1 %v4061_v59 }
 0x17e   : > { %3634 = vmatprep.subr.bf16.mxu1 %v4062_v60 }
 0x181   : > { %3635 = vmatpush3.bf16.msra.mxu1 %v4063_v61 }
 0x182   : > { %3636 = vmatprep.subr.bf16.mxu1 %v4064_v24 }
 0x185   : > { %3637 = vmatpush3.bf16.msra.mxu1 %v4065_v25 }
 0x186   : > { %3638 = vmatprep.subr.bf16.mxu1 %v4066_v26 }
 0x189   : > { %3639 = vmatpush3.bf16.msra.mxu1 %v4067_v27  ;;  %v4077_v27 = vld [vmem:[#allocation4 + $0x278] ss:$44 sps:$4 sm:$0xff]  }
 0x18a   : > { %3640 = vmatprep.subr.bf16.mxu1 %v4068_v28 }
 0x18d   : > { %3641 = vmatpush3.bf16.msra.mxu1 %v4069_v29  ;;  %v4085_v29 = vld [vmem:[#allocation4 + $0x224] ss:$44 sps:$4 sm:$0xff]  }
 0x18e   : > { %3642 = vmatprep.subr.bf16.mxu1 %v4070_v30  ;;  %v4083_v30 = vld [vmem:[#allocation4 + $0x220] ss:$44 sps:$4 sm:$0xff]  }
 0x191   : > { %3643 = vmatpush3.bf16.msra.mxu1 %v4071_v31  ;;  %v4091_v31 = vld [vmem:[#allocation4 + $0x1cc] ss:$44 sps:$4 sm:$0xff]  }
 0x192   : > { %3644 = vmatprep.subr.bf16.mxu1 %v4072_v32  ;;  %v4089_v32 = vld [vmem:[#allocation4 + $0x1c8] ss:$44 sps:$4 sm:$0xff]  }
 0x195   : > { %3645 = vmatpush3.bf16.msra.mxu1 %v4073_v33  ;;  %v4097_v33 = vld [vmem:[#allocation4 + $0x174] ss:$44 sps:$4 sm:$0xff]  }
 0x196   : > { %1939 = vmatprep.subr.bf16.mxu1 %v4079_v36  ;;  %v4101_v36 = vld [vmem:[#allocation4 + $0x118] ss:$44 sps:$4 sm:$0xff]  }
 0x238   : > { %v1303_v8 = vpop.f32.mrf.mxu1 }
 0x239   : > { %v1321_v9 = vadd.f32 %v1319_v6, %v1303_v8 }
 0x23a   : > { %v4659_v12 = vpop.f32.mrf.mxu1 }
 0x23b   : > { %v1330_v14 = vadd.f32 %v3448_v11, %v1321_v9 }
 0x23c   : > { %v1307_v13 = vpop.f32.mrf.mxu1 }
 0x23d   : > { %v1322_v15 = vadd.f32 %v1320_v10, %v1307_v13  ;;  %v1332_v19 = vmax.f32 %v1330_v14, 0.0 }
 0x23f   : > { %v1331_v17 = vadd.f32 %v3448_v11, %v1322_v15 }
 0x241   : > { %v1333_v20 = vmax.f32 %v1331_v17, 0.0 }
 0x243   : > { %v1361_v22 = vpack.c.bf16 %v1333_v20, %v1332_v19 }
 0x245   : > { %1487 = vmatmul.mubr.bf16.vlgmr.msra.gmra.mxu0 %v1361_v22 }
 0x246   : > { %1928 = vmatprep.mubr.bf16.mxu0 %v4404_v55  ;;  %1897 = vmatpush1.bf16.msra.mxu0 %v4074_v34  ;;  %v4095_v34 = vld [vmem:[#allocation4 + $0x170] ss:$44 sps:$4 sm:$0xff]  }
 0x247   : > { %1898 = vmatprep.subr.bf16.mxu0 %v4082_v37  ;;  %v4106_v37 = vld [vmem:[#allocation4 + $0xbc] ss:$44 sps:$4 sm:$0xff]  }
 0x24a   : > { %1899 = vmatpush1.bf16.msra.mxu0 %v4080_v38  ;;  %v4104_v38 = vld [vmem:[#allocation4 + $0xb8] ss:$44 sps:$4 sm:$0xff]  }
 0x24b   : > { %1900 = vmatprep.subr.bf16.mxu0 %v4088_v39  ;;  %v4109_v39 = vld [vmem:[#allocation4 + $0xc4] ss:$44 sps:$4 sm:$0xff]  }
 0x24e   : > { %1901 = vmatpush1.bf16.msra.mxu0 %v4086_v40  ;;  %v4107_v40 = vld [vmem:[#allocation4 + $0xc0] ss:$44 sps:$4 sm:$0xff]  }
 0x24f   : > { %1902 = vmatprep.subr.bf16.mxu0 %v4094_v41  ;;  %v4112_v41 = vld [vmem:[#allocation4 + $0x64] ss:$44 sps:$4 sm:$0xff]  }
 0x252   : > { %1903 = vmatpush1.bf16.msra.mxu0 %v4092_v42  ;;  %v4110_v42 = vld [vmem:[#allocation4 + $0x60] ss:$44 sps:$4 sm:$0xff]  }
 0x253   : > { %1904 = vmatprep.subr.bf16.mxu0 %v4100_v43  ;;  %v4115_v43 = vld [vmem:[#allocation4 + $0x6c] ss:$44 sps:$4 sm:$0xff]  }
 0x256   : > { %1905 = vmatpush1.bf16.msra.mxu0 %v4098_v44  ;;  %v4113_v44 = vld [vmem:[#allocation4 + $0x68] ss:$44 sps:$4 sm:$0xff]  }
 0x257   : > { %1906 = vmatprep.subr.bf16.mxu0 %v4106_v37  ;;  %v4157_v37 = vld [vmem:[%s4975_s3 + $0x15c] ss:$28 sps:$4 sm:$0xff]  }
 0x25a   : > { %1907 = vmatpush1.bf16.msra.mxu0 %v4104_v38  ;;  %v4158_v38 = vld [vmem:[%s4975_s3 + $0x2e4] ss:$28 sps:$4 sm:$0xff]  }
 0x25b   : > { %1908 = vmatprep.subr.bf16.mxu0 %v4112_v41 }
 0x25e   : > { %1909 = vmatpush1.bf16.msra.mxu0 %v4110_v42 }
 0x25f   : > { %1910 = vmatprep.subr.bf16.mxu0 %v4118_v45  ;;  %v3515_v45 = vld [vmem:[%s4977_s5 + $0xb] ss:$0 sm:$0xff] }
 0x305   : > { %v1488_v48 = vpop.f32.mrf.mxu0 }
 0x306   : > { %v1489_v49 = vadd.f32 %v1488_v48, %v1367_v46  ;;  %v4119_v48 = vld [vmem:[#allocation4 + $0x10] ss:$44 sps:$4 sm:$0xff]  }
 0x307   : > { %v1490_v50 = vpop.f32.mrf.mxu0 }
 0x308   : > { %v3728_v51 = vcvt.f32.s32 %v1489_v49  ;;  %v1491_v52 = vadd.f32 %v1490_v50, %v1371_v47  ;;  %v3731_v6 = vand.u32 2147483648, %v1489_v49  ;;  %v3726_v10 = vand.u32 2147483647, %v1489_v49  ;;  %v1309_v50 = vpop.f32.mrf.mxu1 }
 0x309   : > { %v1492_v53 = vpop.f32.mrf.mxu0 }
 0x30a   : > { %v3736_v54 = vcvt.f32.s32 %v1491_v52  ;;  %v3729_v56 = vcvt.s32.f32 %v3728_v51  ;;  %v1493_v57 = vadd.f32 %v1492_v53, %v1367_v46  ;;  %v3739_v2 = vand.u32 2147483648, %v1491_v52  ;;  %v4116_v46 = vld [vmem:[#allocation4 + $0x8] ss:$44 sps:$4 sm:$0xff]  }
 0x30b   : > { %v1494_v58 = vpop.f32.mrf.mxu0  ;;  %v3734_v5 = vand.u32 2147483647, %v1491_v52  ;;  %vm3727_vm3 = vcmp.lt.f32.partialorder %v3726_v10, 8388608.0  ;;  %1911 = vmatpush1.bf16.msra.mxu0 %v4116_v46  ;;  %v4129_v10 = vld [vmem:[#allocation4 + $0x18] ss:$44 sps:$4 sm:$0xff]  }
 0x30c   : > { %v3737_v59 = vcvt.s32.f32 %v3736_v54  ;;  %v1495_v60 = vadd.f32 %v1494_v58, %v1371_v47  ;;  %v3744_v61 = vcvt.f32.s32 %v1493_v57  ;;  %v3730_v0 = vand.u32 2147483647, %v3729_v56  ;;  %v4121_v47 = vld [vmem:[#allocation4 + $0x14] ss:$44 sps:$4 sm:$0xff]   ;;  %v3466_v54 = vld [vmem:[%s4977_s5 + $0x5] ss:$0 sm:$0xff] }
 0x30d   : > { %v3742_v3 = vand.u32 2147483647, %v1493_v57  ;;  %v3747_v8 = vand.u32 2147483648, %v1493_v57  ;;  %vm3735_vm1 = vcmp.lt.f32.partialorder %v3734_v5, 8388608.0  ;;  %v4127_v5 = vld [vmem:[#allocation4 + $0xc8] ss:$44 sps:$4 sm:$0xff]  }
 0x30e   : > { %v3738_v62 = vand.u32 2147483647, %v3737_v59  ;;  %v3752_v63 = vcvt.f32.s32 %v1495_v60  ;;  %v3745_v1 = vcvt.s32.f32 %v3744_v61  ;;  %v3750_v9 = vand.u32 2147483647, %v1495_v60 }
 0x30f   : > { %v3755_v13 = vand.u32 2147483648, %v1495_v60  ;;  %v3732_v15 = vor.u32 %v3731_v6, %v3730_v0  ;;  %vm3743_vm0 = vcmp.lt.f32.partialorder %v3742_v3, 8388608.0  ;;  %v4125_v3 = vld [vmem:[#allocation4 + $0x178] ss:$44 sps:$4 sm:$0xff]   ;;  %v3449_v6 = vld [vmem:[%s4977_s5 + $0xa] ss:$0 sm:$0xff] }
 0x310   : > { %v3753_v4 = vcvt.s32.f32 %v3752_v63  ;;  %v3746_v7 = vand.u32 2147483647, %v3745_v1  ;;  %v3740_v14 = vor.u32 %v3739_v2, %v3738_v62  ;;  %vm3751_vm2 = vcmp.lt.f32.partialorder %v3750_v9, 8388608.0  ;;  %v4122_v63 = vld [vmem:[#allocation4 + $0x280] ss:$44 sps:$4 sm:$0xff]  }
 0x311   : > { %v3733_v26 = vsel %vm3727_vm3, %v3732_v15, %v1489_v49  ;;  %v4405_v49 = vmov 0.0   ;;  %v4123_v1 = vld [vmem:[#allocation4 + $0x228] ss:$44 sps:$4 sm:$0xff]   ;;  %v4124_v2 = vld [vmem:[#allocation4 + $0x1d0] ss:$44 sps:$4 sm:$0xff]   ;;  %v1341_v9 = vadd.f32 %v3449_v6, %v4659_v12 }
 0x312   : > { %v3754_v11 = vand.u32 2147483647, %v3753_v4  ;;  %v3748_v17 = vor.u32 %v3747_v8, %v3746_v7  ;;  %v3741_v22 = vsel %vm3735_vm1, %v3740_v14, %v1491_v52  ;;  %3705 = vmatprep.subr.bf16.mxu0 %v4405_v49  ;;  %v4126_v4 = vld [vmem:[#allocation4 + $0x120] ss:$44 sps:$4 sm:$0xff]   ;;  %v4128_v7 = vld [vmem:[#allocation4 + $0x70] ss:$44 sps:$4 sm:$0xff]   ;;  %v1342_v8 = vadd.f32 %v3449_v6, %v1309_v50 }
 0x313   : > { %v4132_v15 = vld [vmem:[#allocation4 + $0x290] ss:$44 sps:$4 sm:$0xff]   ;;  %v4141_v12 = vld [vmem:[#allocation4 + $0x188] ss:$44 sps:$4 sm:$0xff]  }
 0x314   : > { %v3756_v19 = vor.u32 %v3755_v13, %v3754_v11  ;;  %v3749_v20 = vsel %vm3743_vm0, %v3748_v17, %v1493_v57  ;;  %v1344_v11 = vmax.f32 %v1342_v8, 0.0  ;;  %v1343_v13 = vmax.f32 %v1341_v9, 0.0  ;;  %v4130_v17 = vld [vmem:[#allocation4 + $0x28c] ss:$44 sps:$4 sm:$0xff]  }
 0x315   : > { %v1533_v28 = vpack.c.bf16 %v3749_v20, %v3733_v26  ;;  %v4133_v20 = vld [vmem:[#allocation4 + $0x234] ss:$44 sps:$4 sm:$0xff]   ;;  %v4144_v26 = vld [vmem:[#allocation4 + $0x130] ss:$44 sps:$4 sm:$0xff]  }
 0x316   : > { %v3757_v24 = vsel %vm3751_vm2, %v3756_v19, %v1495_v60  ;;  %v2038_v14 = vpack.c.bf16 %v1344_v11, %v1343_v13  ;;  %v4135_v19 = vld [vmem:[#allocation4 + $0x238] ss:$44 sps:$4 sm:$0xff]  }
 0x317   : > { %v1534_v25 = vpack.c.bf16 %v3757_v24, %v3741_v22  ;;  %v4138_v22 = vld [vmem:[#allocation4 + $0x1e0] ss:$44 sps:$4 sm:$0xff]   ;;  %v4136_v24 = vld [vmem:[#allocation4 + $0x1dc] ss:$44 sps:$4 sm:$0xff]  }
 0x319   : > { %1670 = vmatprep.mubr.bf16.mxu1 %v1534_v25  ;;  %v4139_v25 = vld [vmem:[#allocation4 + $0x184] ss:$44 sps:$4 sm:$0xff]  }
 0x31a   : > { %1671 = vmatmul.mubr.bf16.vlgmr.msra.gmra.mxu1 %v1533_v28  ;;  %v4147_v28 = vld [vmem:[#allocation4 + $0xd8] ss:$44 sps:$4 sm:$0xff]  }
 0x31b   : > { %1940 = vmatpush1.bf16.msra.mxu1 %v4077_v27  ;;  %1971 = vmatprep.mubr.bf16.mxu1 %v4404_v55  ;;  %v4142_v27 = vld [vmem:[#allocation4 + $0x12c] ss:$44 sps:$4 sm:$0xff]  }
 0x31c   : > { %1941 = vmatprep.subr.bf16.mxu1 %v4085_v29  ;;  %v4145_v29 = vld [vmem:[#allocation4 + $0xd4] ss:$44 sps:$4 sm:$0xff]  }
 0x31f   : > { %1942 = vmatpush1.bf16.msra.mxu1 %v4083_v30  ;;  %v4150_v30 = vld [vmem:[#allocation4 + $0x80] ss:$44 sps:$4 sm:$0xff]  }
 0x320   : > { %1943 = vmatprep.subr.bf16.mxu1 %v4091_v31  ;;  %v4148_v31 = vld [vmem:[#allocation4 + $0x7c] ss:$44 sps:$4 sm:$0xff]  }
 0x323   : > { %1944 = vmatpush1.bf16.msra.mxu1 %v4089_v32  ;;  %v4153_v32 = vld [vmem:[#allocation4 + $0x28] ss:$44 sps:$4 sm:$0xff]  }
 0x324   : > { %1945 = vmatprep.subr.bf16.mxu1 %v4097_v33  ;;  %v4151_v33 = vld [vmem:[#allocation4 + $0x24] ss:$44 sps:$4 sm:$0xff]  }
 0x327   : > { %1946 = vmatpush1.bf16.msra.mxu1 %v4095_v34  ;;  %v4154_v34 = vld [vmem:[%s4975_s3 + $0x354] ss:$28 sps:$4 sm:$0xff]  }
 0x328   : > { %1947 = vmatprep.subr.bf16.mxu1 %v4103_v35  ;;  %v4155_v35 = vld [vmem:[%s4975_s3 + $0x194] ss:$28 sps:$4 sm:$0xff]  }
 0x32b   : > { %1948 = vmatpush1.bf16.msra.mxu1 %v4101_v36  ;;  %v4156_v36 = vld [vmem:[%s4975_s3 + $0x31c] ss:$28 sps:$4 sm:$0xff]  }
 0x32c   : > { %1949 = vmatprep.subr.bf16.mxu1 %v4109_v39  ;;  %v4159_v39 = vld [vmem:[%s4975_s3 + $0x124] ss:$28 sps:$4 sm:$0xff]  }
 0x32f   : > { %1950 = vmatpush1.bf16.msra.mxu1 %v4107_v40 }
 0x330   : > { %1951 = vmatprep.subr.bf16.mxu1 %v4115_v43 }
 0x333   : > { %1952 = vmatpush1.bf16.msra.mxu1 %v4113_v44 }
 0x334   : > { %1953 = vmatprep.subr.bf16.mxu1 %v4121_v47 }
 0x337   : > { %1954 = vmatpush1.bf16.msra.mxu1 %v4119_v48 }
 0x338   : > { %2244 = vmatprep.subr.bf16.mxu1 %v4132_v15 }
 0x3da   : > { %v3646_v51 = vpop.f32.mrf.mxu1 }
 0x3dc   : > { %v3647_v52 = vpop.f32.mrf.mxu1 }
 0x3dd   : > { %v3648_v53 = vadd.f32 %v3647_v52, %v3646_v51  ;;  %v4160_v52 = vld [vmem:[%s4975_s3 + $0x2ac] ss:$28 sps:$4 sm:$0xff]  }
 0x3de   : > { %v3649_v56 = vpop.f32.mrf.mxu1 }
 0x3df   : > { %v1673_v58 = vadd.f32 %v3648_v53, %v3466_v54  ;;  %v4161_v53 = vld [vmem:[%s4975_s3 + $0xec] ss:$28 sps:$4 sm:$0xff]  }
 0x3e0   : > { %v3650_v57 = vpop.f32.mrf.mxu1 }
 0x3e1   : > { %v3651_v59 = vadd.f32 %v3650_v57, %v3649_v56  ;;  %v1679_v61 = vmax.f32 %v1673_v58, 0.0  ;;  %v4163_v56 = vld [vmem:[%s4975_s3 + $0xb4] ss:$28 sps:$4 sm:$0xff]   ;;  %v4165_v57 = vld [vmem:[%s4975_s3 + $0x7c] ss:$28 sps:$4 sm:$0xff]  }
 0x3e2   : > { %v4166_v58 = vld [vmem:[%s4975_s3 + $0x204] ss:$28 sps:$4 sm:$0xff]  }
 0x3e3   : > { %v1676_v60 = vadd.f32 %v3651_v59, %v3466_v54  ;;  %v4162_v54 = vld [vmem:[%s4975_s3 + $0x274] ss:$28 sps:$4 sm:$0xff]   ;;  %v4167_v59 = vld [vmem:[%s4975_s3 + $0x44] ss:$28 sps:$4 sm:$0xff]  }
 0x3e5   : > { %v1680_v62 = vmax.f32 %v1676_v60, 0.0  ;;  %v4168_v60 = vld [vmem:[%s4975_s3 + $0x1cc] ss:$28 sps:$4 sm:$0xff]  }
 0x3e7   : > { %v1713_v0 = vpack.c.bf16 %v1680_v62, %v1679_v61  ;;  %v4169_v61 = vld [vmem:[%s4975_s3 + $0xc] ss:$28 sps:$4 sm:$0xff]  }
 0x3e9   : > { %1929 = vmatmul.mubr.bf16.vlgmr.msra.gmra.mxu0 %v1713_v0  ;;  %1972 = vmatmul.mubr.bf16.vlgmr.msra.gmra.mxu1 %v1713_v0  ;;  %v4770_v0 = vld [vmem:[%s4977_s5 + $0x6] sm:$0xf] }
 0x3ea   : > { %3706 = vmatpush3.bf16.msra.mxu0 %v4122_v63  ;;  %3721 = vmatprep.mubr.msk.bf16.mxu0 %vm4406_vm4, %v4405_v49  ;;  %v1726_v63 = vsub.s32 2, %v4612_v18 }
 0x3eb   : > { %3707 = vmatprep.subr.bf16.mxu0 %v4405_v49  ;;  %2276 = vmatprep.mubr.bf16.mxu1 %v4404_v55 }
 0x3ec   : > { %2245 = vmatpush1.bf16.msra.mxu1 %v4130_v17 }
 0x3ed   : > { %2246 = vmatprep.subr.bf16.mxu1 %v4135_v19 }
 0x3ee   : > { %3708 = vmatpush3.bf16.msra.mxu0 %v4123_v1  ;;  %v1730_v1 = vsub.s32 3, %v4612_v18 }
 0x3ef   : > { %3709 = vmatprep.subr.bf16.mxu0 %v4405_v49 }
 0x3f0   : > { %2247 = vmatpush1.bf16.msra.mxu1 %v4133_v20 }
 0x3f1   : > { %2248 = vmatprep.subr.bf16.mxu1 %v4138_v22 }
 0x3f2   : > { %3710 = vmatpush3.bf16.msra.mxu0 %v4124_v2 }
 0x3f3   : > { %3711 = vmatprep.subr.bf16.mxu0 %v4405_v49 }
 0x3f4   : > { %2249 = vmatpush1.bf16.msra.mxu1 %v4136_v24 }
 0x3f5   : > { %2250 = vmatprep.subr.bf16.mxu1 %v4141_v12 }
 0x3f6   : > { %3712 = vmatpush3.bf16.msra.mxu0 %v4125_v3  ;;  %v1727_v3 = vrot.slane %v4770_v0, %v1726_v63 }
 0x3f7   : > { %3713 = vmatprep.subr.bf16.mxu0 %v4405_v49 }
 0x3f8   : > { %2251 = vmatpush1.bf16.msra.mxu1 %v4139_v25 }
 0x3f9   : > { %2252 = vmatprep.subr.bf16.mxu1 %v4144_v26 }
 0x3fa   : > { %3714 = vmatpush3.bf16.msra.mxu0 %v4126_v4  ;;  %v1731_v4 = vrot.slane %v4770_v0, %v1730_v1  ;;  %v1719_v1 = vrot.slane %v4770_v0, %v4621_v23 }
 0x3fb   : > { %3715 = vmatprep.subr.bf16.mxu0 %v4405_v49 }
 0x3fc   : > { %2253 = vmatpush1.bf16.msra.mxu1 %v4142_v27 }
 0x3fd   : > { %2254 = vmatprep.subr.bf16.mxu1 %v4147_v28 }
 0x3fe   : > { %3716 = vmatpush3.bf16.msra.mxu0 %v4127_v5 }
 0x3ff   : > { %3717 = vmatprep.subr.bf16.mxu0 %v4405_v49 }
 0x400   : > { %2255 = vmatpush1.bf16.msra.mxu1 %v4145_v29 }
 0x401   : > { %2256 = vmatprep.subr.bf16.mxu1 %v4150_v30 }
 0x402   : > { %3718 = vmatpush3.bf16.msra.mxu0 %v4128_v7 }
 0x403   : > { %3719 = vmatprep.subr.bf16.mxu0 %v4405_v49 }
 0x404   : > { %2257 = vmatpush1.bf16.msra.mxu1 %v4148_v31 }
 0x405   : > { %2258 = vmatprep.subr.bf16.mxu1 %v4153_v32 }
 0x406   : > { %3720 = vmatpush3.bf16.msra.mxu0 %v4129_v10 }
 0x407   : > { %3661 = vmatprep.subr.bf16.mxu0 %v4154_v34 }
 0x408   : > { %2259 = vmatpush1.bf16.msra.mxu1 %v4151_v33 }
 0x409   : > { %3722 = vmatmul.mubr.bf16.vlgmr.msra.gmra.mxu0 %v2038_v14 }
 0x40a   : > { %3662 = vmatpush3.bf16.msra.mxu0 %v4155_v35 }
 0x40b   : > { %3663 = vmatprep.subr.bf16.mxu0 %v4156_v36 }
 0x40e   : > { %3664 = vmatpush3.bf16.msra.mxu0 %v4157_v37 }
 0x40f   : > { %3665 = vmatprep.subr.bf16.mxu0 %v4158_v38 }
 0x412   : > { %3666 = vmatpush3.bf16.msra.mxu0 %v4159_v39 }
 0x413   : > { %3667 = vmatprep.subr.bf16.mxu0 %v4160_v52 }
 0x416   : > { %3668 = vmatpush3.bf16.msra.mxu0 %v4161_v53 }
 0x417   : > { %3669 = vmatprep.subr.bf16.mxu0 %v4162_v54  ;;  %v2152_v54 = vld [vmem:[%s4977_s5 + $0xc] sm:$0x3] }
 0x41a   : > { %3670 = vmatpush3.bf16.msra.mxu0 %v4163_v56 }
 0x4a9   : > { %v4724_v40 = vpop.f32.mrf.mxu0  ;;  %v1973_v62 = vpop.f32.mrf.mxu1 }
 0x4aa   : > { %v1974_v6 = vadd.f32 %v1973_v62, %v1727_v3 }
 0x4ab   : > { %v4726_v41 = vpop.f32.mrf.mxu0  ;;  %v1975_v2 = vpop.f32.mrf.mxu1 }
 0x4ac   : > { %v1976_v7 = vadd.f32 %v1975_v2, %v1731_v4  ;;  %v1986_v9 = vand.u32 2147483647, %v1974_v6  ;;  %v1982_v38 = vmax.f32 %v1974_v6, 0.0 }
 0x4ad   : > { %v4728_v42 = vpop.f32.mrf.mxu0  ;;  %v1977_v5 = vpop.f32.mrf.mxu1 }
 0x4ae   : > { %v1978_v10 = vadd.f32 %v1977_v5, %v1727_v3  ;;  %v1987_v11 = vand.u32 2147483647, %v1976_v7  ;;  %v1990_v14 = vsub.f32 0.0, %v1986_v9 }
 0x4af   : > { %v4730_v43 = vpop.f32.mrf.mxu0  ;;  %v1979_v8 = vpop.f32.mrf.mxu1 }
 0x4b0   : > { %v1980_v13 = vadd.f32 %v1979_v8, %v1731_v4  ;;  %v1988_v15 = vand.u32 2147483647, %v1978_v10  ;;  %v1991_v17 = vsub.f32 0.0, %v1987_v11  ;;  %v1994_v20 = vmul.f32 1.442695, %v1990_v14 }
 0x4b2   : > { %v1989_v19 = vand.u32 2147483647, %v1980_v13  ;;  %v1992_v22 = vsub.f32 0.0, %v1988_v15  ;;  %v1996_v18 = vmul.f32 1.442695, %v1991_v17  ;;  %4262 = vpow2.f32 %v1994_v20 }
 0x4b3   : > { %v1985_v53 = vmax.f32 %v1980_v13, 0.0 }
 0x4b4   : > { %v1993_v24 = vsub.f32 0.0, %v1989_v19  ;;  %v1998_v12 = vmul.f32 1.442695, %v1992_v22  ;;  %4264 = vpow2.f32 %v1996_v18 }
 0x4b6   : > { %v2000_v25 = vmul.f32 1.442695, %v1993_v24  ;;  %4266 = vpow2.f32 %v1998_v12 }
 0x4b8   : > { %4268 = vpow2.f32 %v2000_v25 }
 0x4bf   : > { %v4263_v26 = vpop.eup %4262 }
 0x4c0   : > { %v2002_v28 = vadd.f32 1.0, %v4263_v26 }
 0x4c1   : > { %v4265_v27 = vpop.eup %4264 }
 0x4c2   : > { %v2003_v30 = vadd.f32 1.0, %v4265_v27  ;;  %4270 = vlog2.f32 %v2002_v28 }
 0x4c3   : > { %v4267_v29 = vpop.eup %4266 }
 0x4c4   : > { %v2004_v32 = vadd.f32 1.0, %v4267_v29  ;;  %4272 = vlog2.f32 %v2003_v30 }
 0x4c5   : > { %v4269_v31 = vpop.eup %4268 }
 0x4c6   : > { %v2005_v33 = vadd.f32 1.0, %v4269_v31  ;;  %4274 = vlog2.f32 %v2004_v32 }
 0x4c8   : > { %4276 = vlog2.f32 %v2005_v33 }
 0x4c9   : > { %v2128_v44 = vpop.f32.mrf.mxu0 }
 0x4ca   : > { %v2129_v48 = vadd.f32 %v3515_v45, %v2128_v44 }
 0x4cb   : > { %v3723_v46 = vpop.f32.mrf.mxu0 }
 0x4cc   : > { %v1983_v46 = vmax.f32 %v1976_v7, 0.0  ;;  %v1723_v7 = vrot.slane %v4770_v0, %v4615_v21  ;;  %v1935_v0 = vadd.f32 %v4728_v42, %v1719_v1 }
 0x4cd   : > { %v2131_v47 = vpop.f32.mrf.mxu0 }
 0x4ce   : > { %v2132_v49 = vadd.f32 %v3515_v45, %v2131_v47  ;;  %v1933_v12 = vadd.f32 %v4726_v41, %v1723_v7  ;;  %v1937_v42 = vadd.f32 %v4730_v43, %v1723_v7 }
 0x4cf   : > { %v3724_v50 = vpop.f32.mrf.mxu0  ;;  %v4271_v34 = vpop.eup %4270 }
 0x4d0   : > { %v2151_v51 = vpack.c.bf16 %v2132_v49, %v2129_v48  ;;  %v2007_v36 = vmul.f32 0.6931472, %v4271_v34  ;;  %v1984_v49 = vmax.f32 %v1978_v10, 0.0  ;;  %v1931_v10 = vadd.f32 %v4724_v40, %v1719_v1 }
 0x4d1   : > { %v4273_v35 = vpop.eup %4272 }
 0x4d2   : > { %2277 = vmatmul.mubr.bf16.vlgmr.msra.gmra.mxu1 %v2151_v51  ;;  %v2009_v39 = vmul.f32 0.6931472, %v4273_v35  ;;  %v2014_v45 = vadd.f32 %v2007_v36, %v1982_v38 }
 0x4d3   : > { %2676 = vmatprep.mubr.bf16.mxu1 %v4404_v55  ;;  %v4164_v55 = vld [vmem:[%s4975_s3 + $0x23c] ss:$28 sps:$4 sm:$0xff]   ;;  %v4275_v37 = vpop.eup %4274 }
 0x4d4   : > { %3671 = vmatprep.subr.bf16.mxu0 %v4164_v55  ;;  %v2011_v47 = vmul.f32 0.6931472, %v4275_v37  ;;  %v2015_v48 = vadd.f32 %v2009_v39, %v1983_v46  ;;  %v2018_v51 = vadd.f32 1e-06, %v2014_v45 }
 0x4d5   : > { %3672 = vmatpush3.bf16.msra.mxu0 %v4165_v57  ;;  %v4277_v44 = vpop.eup %4276  ;;  %v2157_v57 = vrot.slane %v2152_v54, %v4621_v23 }
 0x4d6   : > { %3673 = vmatprep.subr.bf16.mxu0 %v4166_v58  ;;  %v2013_v50 = vmul.f32 0.6931472, %v4277_v44  ;;  %v2016_v52 = vadd.f32 %v2011_v47, %v1984_v49  ;;  %v2019_v56 = vadd.f32 1e-06, %v2015_v48  ;;  %v3118_v58 = vmul.f32 1.4142135, %v2018_v51 }
 0x4d8   : > { %v2017_v55 = vadd.f32 %v2013_v50, %v1985_v53  ;;  %4278 = vrcp.f32 %v3118_v58 }
 0x4d9   : > { %3674 = vmatpush3.bf16.msra.mxu0 %v4167_v59  ;;  %v2020_v59 = vadd.f32 1e-06, %v2016_v52 }
 0x4da   : > { %3675 = vmatprep.subr.bf16.mxu0 %v4168_v60  ;;  %v2161_v60 = vrot.slane %v2152_v54, %v4615_v21  ;;  %v2021_v62 = vadd.f32 1e-06, %v2017_v55 }
 0x4db   : > { %v3120_v3 = vmul.f32 1.4142135, %v2020_v59 }
 0x4dc   : > { %v3121_v8 = vmul.f32 1.4142135, %v2021_v62 }
 0x4dd   : > { %3676 = vmatpush3.bf16.msra.mxu0 %v4169_v61  ;;  %v3119_v61 = vmul.f32 1.4142135, %v2019_v56 }
 0x4df   : > { %4280 = vrcp.f32 %v3119_v61 }
 0x4e0   : > { %4282 = vrcp.f32 %v3120_v3 }
 0x4e1   : > { %4284 = vrcp.f32 %v3121_v8 }
 0x4e5   : > { %v4279_v49 = vpop.eup %4278 }
 0x4ec   : > { %v4281_v55 = vpop.eup %4280 }
 0x592   : > { %v2278_v63 = vpop.f32.mrf.mxu1 }
 0x593   : > { %v2279_v2 = vadd.f32 %v2278_v63, %v2157_v57  ;;  %v4283_v63 = vpop.eup %4282 }
 0x594   : > { %v2280_v4 = vpop.f32.mrf.mxu1  ;;  %v4285_v7 = vpop.eup %4284 }
 0x595   : > { %v3760_v5 = vcvt.f32.s32 %v2279_v2  ;;  %v2281_v6 = vadd.f32 %v2280_v4, %v2161_v60  ;;  %v3758_v14 = vand.u32 2147483647, %v2279_v2  ;;  %v3763_v22 = vand.u32 2147483648, %v2279_v2 }
 0x596   : > { %v2282_v9 = vpop.f32.mrf.mxu1 }
 0x597   : > { %v3761_v11 = vcvt.s32.f32 %v3760_v5  ;;  %v3768_v13 = vcvt.f32.s32 %v2281_v6  ;;  %v3766_v15 = vand.u32 2147483647, %v2281_v6  ;;  %v2283_v17 = vadd.f32 %v2282_v9, %v2157_v57 }
 0x598   : > { %v2284_v19 = vpop.f32.mrf.mxu1  ;;  %v3771_v40 = vand.u32 2147483648, %v2281_v6  ;;  %vm3759_vm5 = vcmp.lt.f32.partialorder %v3758_v14, 8388608.0 }
 0x599   : > { %v3762_v20 = vand.u32 2147483647, %v3761_v11  ;;  %v3769_v18 = vcvt.s32.f32 %v3768_v13  ;;  %v2285_v24 = vadd.f32 %v2284_v19, %v2161_v60  ;;  %v3776_v25 = vcvt.f32.s32 %v2283_v17 }
 0x59a   : > { %v3774_v29 = vand.u32 2147483647, %v2283_v17  ;;  %vm3767_vm6 = vcmp.lt.f32.partialorder %v3766_v15, 8388608.0  ;;  %v3779_v41 = vand.u32 2147483648, %v2283_v17 }
 0x59b   : > { %v3764_v26 = vor.u32 %v3763_v22, %v3762_v20  ;;  %v3770_v27 = vand.u32 2147483647, %v3769_v18  ;;  %v3784_v28 = vcvt.f32.s32 %v2285_v24  ;;  %v3777_v30 = vcvt.s32.f32 %v3776_v25 }
 0x59c   : > { %v3782_v33 = vand.u32 2147483647, %v2285_v24  ;;  %v3787_v39 = vand.u32 2147483648, %v2285_v24  ;;  %vm3775_vm7 = vcmp.lt.f32.partialorder %v3774_v29, 8388608.0 }
 0x59d   : > { %v3765_v31 = vsel %vm3759_vm5, %v3764_v26, %v2279_v2  ;;  %v3772_v32 = vor.u32 %v3771_v40, %v3770_v27  ;;  %v3785_v34 = vcvt.s32.f32 %v3784_v28  ;;  %v3778_v37 = vand.u32 2147483647, %v3777_v30 }
 0x59e   : > { %v3624_v35 = vadd.f32 -0.5, %v3765_v31  ;;  %v3142_v36 = vadd.f32 0.5, %v3765_v31  ;;  %vm3783_vm8 = vcmp.lt.f32.partialorder %v3782_v33, 8388608.0 }
 0x59f   : > { %v3786_v38 = vand.u32 2147483647, %v3785_v34  ;;  %v3773_v44 = vsel %vm3767_vm6, %v3772_v32, %v2281_v6  ;;  %v3780_v47 = vor.u32 %v3779_v41, %v3778_v37 }
 0x5a0   : > { %v3134_v45 = vsub.f32 %v3624_v35, %v1931_v10  ;;  %v3146_v46 = vsub.f32 %v3142_v36, %v1931_v10  ;;  %v3625_v48 = vadd.f32 -0.5, %v3773_v44  ;;  %v3143_v51 = vadd.f32 0.5, %v3773_v44 }
 0x5a1   : > { %v3788_v50 = vor.u32 %v3787_v39, %v3786_v38  ;;  %v3781_v54 = vsel %vm3775_vm7, %v3780_v47, %v2283_v17 }
 0x5a2   : > { %v3138_v52 = vmul.f32 %v4279_v49, %v3134_v45  ;;  %v3150_v53 = vmul.f32 %v4279_v49, %v3146_v46  ;;  %v3135_v56 = vsub.f32 %v3625_v48, %v1933_v12  ;;  %v3626_v57 = vadd.f32 -0.5, %v3781_v54 }
 0x5a3   : > { %v3144_v58 = vadd.f32 0.5, %v3781_v54  ;;  %v3789_v43 = vsel %vm3783_vm8, %v3788_v50, %v2285_v24  ;;  %v3147_v59 = vsub.f32 %v3143_v51, %v1933_v12  ;;  %v2323_v6 = vpack.c.bf16 %v3781_v54, %v3765_v31  ;;  %v2469_v51 = vld [vmem:[%s4649_s15] sm:$0xff] }
 0x5a4   : > { %4286 = verf.f32 %v3150_v53  ;;  %v2324_v60 = vpack.c.bf16 %v3789_v43, %v3773_v44  ;;  %v3627_v61 = vadd.f32 -0.5, %v3789_v43  ;;  %v3139_v62 = vmul.f32 %v4281_v55, %v3135_v56  ;;  %v2470_v53 = vld [vmem:[%s4649_s15 + $0x18] sm:$0xff] }
 0x5a5   : > { %4288 = verf.f32 %v3138_v52  ;;  %v3136_v1 = vsub.f32 %v3626_v57, %v1935_v0  ;;  %v3148_v2 = vsub.f32 %v3144_v58, %v1935_v0  ;;  %v3145_v3 = vadd.f32 0.5, %v3789_v43 }
 0x5a6   : > { %2460 = vmatprep.mubr.bf16.mxu0 %v2324_v60  ;;  %v3137_v4 = vsub.f32 %v3627_v61, %v1937_v42  ;;  %v3151_v5 = vmul.f32 %v4281_v55, %v3147_v59  ;;  %4290 = verf.f32 %v3139_v62  ;;  %v2471_v52 = vadd.f32 1e-20, %v2469_v51 }
 0x5a7   : > { %v3140_v8 = vmul.f32 %v4283_v63, %v3136_v1  ;;  %v3152_v9 = vmul.f32 %v4283_v63, %v3148_v2  ;;  %v3149_v10 = vsub.f32 %v3145_v3, %v1937_v42  ;;  %2461 = vmatmul.mubr.bf16.vlgmr.msra.gmra.mxu0 %v2323_v6  ;;  %v2472_v54 = vadd.f32 1e-20, %v2470_v53  ;;  %v3540_v3 = vld [vmem:[%s4977_s5 + $0xe] ss:$0 sm:$0xff]  ;;  %v4190_v53 = vld [vmem:[#allocation4 + $0x78] ss:$44 sps:$4 sm:$0xff]  }
 0x5a8   : > { %v3141_v11 = vmul.f32 %v4285_v7, %v3137_v4  ;;  %4292 = verf.f32 %v3151_v5 }
 0x5a9   : > { %4294 = verf.f32 %v3152_v9  ;;  %v3153_v13 = vmul.f32 %v4285_v7, %v3149_v10 }
 0x5aa   : > { %4296 = verf.f32 %v3140_v8 }
 0x5ab   : > { %4298 = verf.f32 %v3153_v13 }
 0x5ac   : > { %4300 = verf.f32 %v3141_v11 }
 0x5b1   : > { %v4287_v14 = vpop.eup %4286 }
 0x5b2   : > { %v4289_v15 = vpop.eup %4288 }
 0x5b3   : > { %v4291_v17 = vpop.eup %4290  ;;  %v3162_v19 = vsub.f32 %v4287_v14, %v4289_v15 }
 0x5b5   : > { %v4293_v20 = vpop.eup %4292  ;;  %v3166_v22 = vmul.f32 0.5, %v3162_v19 }
 0x5b6   : > { %v4295_v18 = vpop.eup %4294  ;;  %v3163_v24 = vsub.f32 %v4293_v20, %v4291_v17 }
 0x5b7   : > { %v4297_v12 = vpop.eup %4296  ;;  %v3170_v0 = vmax.f32 %v3166_v22, 1e-12 }
 0x5b8   : > { %v4299_v25 = vpop.eup %4298  ;;  %v3164_v26 = vsub.f32 %v4295_v18, %v4297_v12  ;;  %v3167_v27 = vmul.f32 0.5, %v3163_v24 }
 0x5b9   : > { %v4301_v40 = vpop.eup %4300  ;;  %v3174_v28 = vadd.f32 1e-09, %v3170_v0 }
 0x5ba   : > { %v3165_v29 = vsub.f32 %v4299_v25, %v4301_v40  ;;  %v3168_v30 = vmul.f32 0.5, %v3164_v26  ;;  %v3171_v31 = vmax.f32 %v3167_v27, 1e-12 }
 0x5bb   : > { %4302 = vlog2.f32 %v3174_v28 }
 0x5bc   : > { %v3169_v32 = vmul.f32 0.5, %v3165_v29  ;;  %v3172_v33 = vmax.f32 %v3168_v30, 1e-12  ;;  %v3175_v34 = vadd.f32 1e-09, %v3171_v31 }
 0x5be   : > { %v3173_v35 = vmax.f32 %v3169_v32, 1e-12  ;;  %v3176_v36 = vadd.f32 1e-09, %v3172_v33  ;;  %4304 = vlog2.f32 %v3175_v34 }
 0x5c0   : > { %v3177_v37 = vadd.f32 1e-09, %v3173_v35  ;;  %4306 = vlog2.f32 %v3176_v36  ;;  %v4170_v36 = vld [vmem:[#allocation4 + $0x284] ss:$44 sps:$4 sm:$0xff]  }
 0x5c2   : > { %4308 = vlog2.f32 %v3177_v37  ;;  %v4172_v37 = vld [vmem:[#allocation4 + $0x288] ss:$44 sps:$4 sm:$0xff]  }
 0x5c3   : > { %4310 = vlog2.f32 %v2471_v52  ;;  %2644 = vmatprep.subr.bf16.mxu1 %v4172_v37  ;;  %v4328_v37 = vld [vmem:[%s4649_s15 + $0x10] sm:$0xff] }
 0x5c4   : > { %4312 = vlog2.f32 %v2472_v54  ;;  %2645 = vmatpush1.bf16.msra.mxu1 %v4170_v36  ;;  %v4188_v54 = vld [vmem:[#allocation4 + $0x74] ss:$44 sps:$4 sm:$0xff]  }
 0x5c5   : > { %v2530_v36 = vld [vmem:[%s4649_s15 + $0x20] sm:$0xff] }
 0x5c8   : > { %v4303_v41 = vpop.eup %4302 }
 0x5c9   : > { %v3179_v38 = vmul.f32 0.6931472, %v4303_v41  ;;  %v4175_v41 = vld [vmem:[#allocation4 + $0x230] ss:$44 sps:$4 sm:$0xff]  }
 0x5ca   : > { %2646 = vmatprep.subr.bf16.mxu1 %v4175_v41 }
 0x5cb   : > { %v4305_v42 = vpop.eup %4304 }
 0x5cc   : > { %v3181_v39 = vmul.f32 0.6931472, %v4305_v42  ;;  %v4173_v42 = vld [vmem:[#allocation4 + $0x22c] ss:$44 sps:$4 sm:$0xff]  }
 0x5cd   : > { %v4307_v44 = vpop.eup %4306  ;;  %2647 = vmatpush1.bf16.msra.mxu1 %v4173_v42  ;;  %v4329_v42 = vld [vmem:[%s4649_s15 + $0x28] sm:$0xff] }
 0x5ce   : > { %v3183_v45 = vmul.f32 0.6931472, %v4307_v44  ;;  %v3186_v46 = vadd.f32 %v3181_v39, %v3179_v38  ;;  %v4178_v38 = vld [vmem:[#allocation4 + $0x1d8] ss:$44 sps:$4 sm:$0xff]   ;;  %v4176_v39 = vld [vmem:[#allocation4 + $0x1d4] ss:$44 sps:$4 sm:$0xff]  }
 0x5cf   : > { %v4309_v47 = vpop.eup %4308  ;;  %2648 = vmatprep.subr.bf16.mxu1 %v4178_v38  ;;  %v4181_v44 = vld [vmem:[#allocation4 + $0x180] ss:$44 sps:$4 sm:$0xff]   ;;  %v2532_v38 = vmul.f32 %v4329_v42, %v2530_v36 }
 0x5d0   : > { %v3185_v48 = vmul.f32 0.6931472, %v4309_v47  ;;  %v3187_v49 = vadd.f32 %v3186_v46, %v3183_v45  ;;  %v4311_v56 = vpop.eup %4310  ;;  %v4179_v45 = vld [vmem:[#allocation4 + $0x17c] ss:$44 sps:$4 sm:$0xff]   ;;  %v4182_v47 = vld [vmem:[#allocation4 + $0x124] ss:$44 sps:$4 sm:$0xff]  }
 0x5d1   : > { %v2474_v55 = vmul.f32 0.6931472, %v4311_v56  ;;  %v4313_v57 = vpop.eup %4312  ;;  %2649 = vmatpush1.bf16.msra.mxu1 %v4176_v39  ;;  %v4184_v46 = vld [vmem:[#allocation4 + $0x128] ss:$44 sps:$4 sm:$0xff]  }
 0x5d2   : > { %v3188_v50 = vadd.f32 %v3187_v49, %v3185_v48  ;;  %v2476_v43 = vmul.f32 0.6931472, %v4313_v57  ;;  %2650 = vmatprep.subr.bf16.mxu1 %v4181_v44  ;;  %v4187_v48 = vld [vmem:[#allocation4 + $0xd0] ss:$44 sps:$4 sm:$0xff]   ;;  %v4185_v49 = vld [vmem:[#allocation4 + $0xcc] ss:$44 sps:$4 sm:$0xff]  }
 0x5d3   : > { %v2477_v58 = vsub.f32 0.0, %v2474_v55  ;;  %v4193_v57 = vld [vmem:[#allocation4 + $0x20] ss:$44 sps:$4 sm:$0xff]  }
 0x5d4   : > { %v2478_v60 = vsub.f32 0.0, %v2476_v43 }
 0x5d5   : > { %v2479_v59 = vadd.f32 1e-20, %v2477_v58  ;;  %2651 = vmatpush1.bf16.msra.mxu1 %v4179_v45  ;;  %v4191_v58 = vld [vmem:[#allocation4 + $0x1c] ss:$44 sps:$4 sm:$0xff]  }
 0x5d6   : > { %v2480_v61 = vadd.f32 1e-20, %v2478_v60  ;;  %2652 = vmatprep.subr.bf16.mxu1 %v4184_v46  ;;  %v4196_v60 = vld [vmem:[%s4975_s3 + $0x19c] ss:$28 sps:$4 sm:$0xff]  }
 0x5d7   : > { %4314 = vlog2.f32 %v2479_v59  ;;  %v4194_v59 = vld [vmem:[%s4975_s3 + $0x198] ss:$28 sps:$4 sm:$0xff]   ;;  %2893 = vmatprep.subr.bf16.mxu0 %v4196_v60  ;;  %v4250_v60 = vld [vmem:[%s4975_s3 + $0x280] ss:$28 sps:$4 sm:$0xff]  }
 0x5d8   : > { %4316 = vlog2.f32 %v2480_v61  ;;  %2894 = vmatpush1.bf16.msra.mxu0 %v4194_v59  ;;  %v4249_v59 = vld [vmem:[%s4975_s3 + $0xf8] ss:$28 sps:$4 sm:$0xff]  }
 0x5d9   : > { %2653 = vmatpush1.bf16.msra.mxu1 %v4182_v47 }
 0x5da   : > { %2654 = vmatprep.subr.bf16.mxu1 %v4187_v48 }
 0x5dd   : > { %2655 = vmatpush1.bf16.msra.mxu1 %v4185_v49  ;;  %v4233_v49 = vld [vmem:[%s4975_s3 + $0x240] ss:$28 sps:$4 sm:$0xff]  }
 0x5de   : > { %2656 = vmatprep.subr.bf16.mxu1 %v4190_v53  ;;  %v4242_v53 = vld [vmem:[%s4975_s3 + $0x360] ss:$28 sps:$4 sm:$0xff]  }
 0x5e1   : > { %2657 = vmatpush1.bf16.msra.mxu1 %v4188_v54  ;;  %v4243_v54 = vld [vmem:[%s4975_s3 + $0x1a0] ss:$28 sps:$4 sm:$0xff]  }
 0x5e2   : > { %2658 = vmatprep.subr.bf16.mxu1 %v4193_v57  ;;  %v4246_v57 = vld [vmem:[%s4975_s3 + $0x2f0] ss:$28 sps:$4 sm:$0xff]  }
 0x5e4   : > { %v4315_v62 = vpop.eup %4314 }
 0x5e5   : > { %v2482_v63 = vmul.f32 0.6931472, %v4315_v62  ;;  %v4317_v1 = vpop.eup %4316  ;;  %2659 = vmatpush1.bf16.msra.mxu1 %v4191_v58  ;;  %v4199_v62 = vld [vmem:[%s4975_s3 + $0x164] ss:$28 sps:$4 sm:$0xff]   ;;  %v4247_v58 = vld [vmem:[%s4975_s3 + $0x130] ss:$28 sps:$4 sm:$0xff]  }
 0x5e6   : > { %v2484_v7 = vmul.f32 0.6931472, %v4317_v1  ;;  %2895 = vmatprep.subr.bf16.mxu0 %v4199_v62  ;;  %v4202_v1 = vld [vmem:[%s4975_s3 + $0x12c] ss:$28 sps:$4 sm:$0xff]   ;;  %3683 = vmatprep.subr.bf16.mxu1 %v4242_v53 }
 0x5e7   : > { %v2485_v6 = vsub.f32 0.0, %v2482_v63  ;;  %v4197_v63 = vld [vmem:[%s4975_s3 + $0x160] ss:$28 sps:$4 sm:$0xff]  }
 0x5e8   : > { %v2486_v14 = vsub.f32 0.0, %v2484_v7  ;;  %2896 = vmatpush1.bf16.msra.mxu0 %v4197_v63  ;;  %v4211_v7 = vld [vmem:[%s4975_s3 + $0x84] ss:$28 sps:$4 sm:$0xff]   ;;  %v2552_v63 = vld [vmem:[%s4977_s5 + $0xf] sm:$0x3] }
 0x5e9   : > { %2897 = vmatprep.subr.bf16.mxu0 %v4202_v1 }
 0x667   : > { %v3677_v2 = vpop.f32.mrf.mxu0 }
 0x669   : > { %v3678_v4 = vpop.f32.mrf.mxu0 }
 0x66a   : > { %v3679_v5 = vadd.f32 %v3678_v4, %v3677_v2  ;;  %v4200_v2 = vld [vmem:[%s4975_s3 + $0x128] ss:$28 sps:$4 sm:$0xff]   ;;  %v4203_v4 = vld [vmem:[%s4975_s3 + $0xf0] ss:$28 sps:$4 sm:$0xff]  }
 0x66b   : > { %v3680_v8 = vpop.f32.mrf.mxu0  ;;  %2898 = vmatpush1.bf16.msra.mxu0 %v4200_v2  ;;  %v2561_v2 = vrot.slane %v2552_v63, %v4615_v21 }
 0x66c   : > { %v2463_v9 = vadd.f32 %v3679_v5, %v3540_v3  ;;  %v4208_v5 = vld [vmem:[%s4975_s3 + $0xbc] ss:$28 sps:$4 sm:$0xff]  }
 0x66d   : > { %v3681_v10 = vpop.f32.mrf.mxu0 }
 0x66e   : > { %v2487_v11 = vadd.f32 %v2485_v6, %v2463_v9  ;;  %v3682_v13 = vadd.f32 %v3681_v10, %v3680_v8  ;;  %v4206_v6 = vld [vmem:[%s4975_s3 + $0xb8] ss:$28 sps:$4 sm:$0xff]   ;;  %v4209_v8 = vld [vmem:[%s4975_s3 + $0x80] ss:$28 sps:$4 sm:$0xff]   ;;  %v4214_v9 = vld [vmem:[%s4975_s3 + $0x4c] ss:$28 sps:$4 sm:$0xff]  }
 0x66f   : > { %v4212_v10 = vld [vmem:[%s4975_s3 + $0x48] ss:$28 sps:$4 sm:$0xff]  }
 0x670   : > { %v2489_v15 = vsub.f32 0.0, %v2487_v11  ;;  %v2466_v17 = vadd.f32 %v3682_v13, %v3540_v3  ;;  %v4205_v3 = vld [vmem:[%s4975_s3 + $0xf4] ss:$28 sps:$4 sm:$0xff]  }
 0x671   : > { %2899 = vmatprep.subr.bf16.mxu0 %v4205_v3  ;;  %v4217_v11 = vld [vmem:[%s4975_s3 + $0x14] ss:$28 sps:$4 sm:$0xff]   ;;  %v2557_v3 = vrot.slane %v2552_v63, %v4621_v23 }
 0x672   : > { %v2491_v19 = vmul.f32 1.442695, %v2489_v15  ;;  %v2488_v20 = vadd.f32 %v2486_v14, %v2466_v17  ;;  %2900 = vmatpush1.bf16.msra.mxu0 %v4203_v4  ;;  %v4215_v13 = vld [vmem:[%s4975_s3 + $0x10] ss:$28 sps:$4 sm:$0xff]   ;;  %v4220_v14 = vld [vmem:[%s4975_s3 + $0x35c] ss:$28 sps:$4 sm:$0xff]  }
 0x673   : > { %2901 = vmatprep.subr.bf16.mxu0 %v4208_v5  ;;  %v4218_v15 = vld [vmem:[%s4975_s3 + $0x358] ss:$28 sps:$4 sm:$0xff]   ;;  %v4223_v17 = vld [vmem:[%s4975_s3 + $0x324] ss:$28 sps:$4 sm:$0xff]  }
 0x674   : > { %4318 = vpow2.f32 %v2491_v19  ;;  %v2490_v22 = vsub.f32 0.0, %v2488_v20  ;;  %v4221_v19 = vld [vmem:[%s4975_s3 + $0x320] ss:$28 sps:$4 sm:$0xff]   ;;  %v4226_v20 = vld [vmem:[%s4975_s3 + $0x2ec] ss:$28 sps:$4 sm:$0xff]  }
 0x676   : > { %v2493_v18 = vmul.f32 1.442695, %v2490_v22  ;;  %2902 = vmatpush1.bf16.msra.mxu0 %v4206_v6  ;;  %v4224_v22 = vld [vmem:[%s4975_s3 + $0x2e8] ss:$28 sps:$4 sm:$0xff]  }
 0x677   : > { %2903 = vmatprep.subr.bf16.mxu0 %v4211_v7 }
 0x678   : > { %4320 = vpow2.f32 %v2493_v18  ;;  %v4229_v18 = vld [vmem:[%s4975_s3 + $0x2b4] ss:$28 sps:$4 sm:$0xff]  }
 0x67a   : > { %2904 = vmatpush1.bf16.msra.mxu0 %v4209_v8 }
 0x67b   : > { %2905 = vmatprep.subr.bf16.mxu0 %v4214_v9 }
 0x67e   : > { %2906 = vmatpush1.bf16.msra.mxu0 %v4212_v10 }
 0x67f   : > { %2907 = vmatprep.subr.bf16.mxu0 %v4217_v11 }
 0x681   : > { %v4319_v24 = vpop.eup %4318 }
 0x682   : > { %v2495_v12 = vadd.f32 1.0, %v4319_v24  ;;  %2908 = vmatpush1.bf16.msra.mxu0 %v4215_v13  ;;  %v4227_v24 = vld [vmem:[%s4975_s3 + $0x2b0] ss:$28 sps:$4 sm:$0xff]   ;;  %v4252_v13 = vld [vmem:[%s4975_s3 + $0x248] ss:$28 sps:$4 sm:$0xff]  }
 0x683   : > { %2909 = vmatprep.subr.bf16.mxu0 %v4220_v14  ;;  %v4253_v14 = vld [vmem:[%s4975_s3 + $0x88] ss:$28 sps:$4 sm:$0xff]  }
 0x684   : > { %4322 = vrcp.f32 %v2495_v12  ;;  %v4232_v12 = vld [vmem:[%s4975_s3 + $0x27c] ss:$28 sps:$4 sm:$0xff]  }
 0x685   : > { %v4321_v0 = vpop.eup %4320 }
 0x686   : > { %v2496_v25 = vadd.f32 1.0, %v4321_v0  ;;  %2910 = vmatpush2.bf16.msra.mxu0 %v4218_v15  ;;  %v4254_v15 = vld [vmem:[%s4975_s3 + $0x210] ss:$28 sps:$4 sm:$0xff]  }
 0x687   : > { %2911 = vmatprep.subr.bf16.mxu0 %v4223_v17  ;;  %v4255_v17 = vld [vmem:[%s4975_s3 + $0x50] ss:$28 sps:$4 sm:$0xff]  }
 0x688   : > { %4324 = vrcp.f32 %v2496_v25  ;;  %v4230_v25 = vld [vmem:[%s4975_s3 + $0x278] ss:$28 sps:$4 sm:$0xff]  }
 0x68a   : > { %2912 = vmatpush2.bf16.msra.mxu0 %v4221_v19  ;;  %v4256_v19 = vld [vmem:[%s4975_s3 + $0x1d8] ss:$28 sps:$4 sm:$0xff]  }
 0x68b   : > { %2913 = vmatprep.subr.bf16.mxu0 %v4226_v20  ;;  %v4257_v20 = vld [vmem:[%s4975_s3 + $0x18] ss:$28 sps:$4 sm:$0xff]  }
 0x68e   : > { %2914 = vmatpush2.bf16.msra.mxu0 %v4224_v22  ;;  %v2721_v22 = vld [vmem:[%s4977_s5 + $0x11] sm:$0x3] }
 0x68f   : > { %2915 = vmatprep.subr.bf16.mxu0 %v4229_v18 }
 0x691   : > { %v4323_v26 = vpop.eup %4322 }
 0x692   : > { %v2501_v27 = vmul.f32 2.0, %v4323_v26  ;;  %2916 = vmatpush2.bf16.msra.mxu0 %v4227_v24  ;;  %v2730_v24 = vrot.slane %v2721_v22, %v4615_v21 }
 0x693   : > { %2917 = vmatprep.subr.bf16.mxu0 %v4232_v12  ;;  %v2726_v12 = vrot.slane %v2721_v22, %v4621_v23  ;;  %v3202_v23 = vand.u32 127, %v418_v16 }
 0x694   : > { %v3557_v40 = vadd.f32 -1.0, %v2501_v27 }
 0x695   : > { %v4325_v28 = vpop.eup %4324  ;;  %vm3203_vm9 = vcmp.eq.s32.totalorder %v3202_v23, 2 }
 0x696   : > { %v2502_v29 = vmul.f32 2.0, %v4325_v28  ;;  %v4793_v31 = vmul.f32 0.65465367, %v3557_v40  ;;  %2918 = vmatpush2.bf16.msra.mxu0 %v4230_v25 }
 0x698   : > { %v3558_v30 = vadd.f32 -1.0, %v2502_v29  ;;  %v2507_v33 = vmul.f32 %v4793_v31, %v4793_v31 }
 0x69a   : > { %v4795_v32 = vmul.f32 0.65465367, %v3558_v30 }
 0x69c   : > { %v2508_v34 = vmul.f32 %v4795_v32, %v4795_v32 }
 0x69e   : > { %v2509_v35 = vadd.f32 %v2508_v34, %v2507_v33 }
 0x6a0   : > { %2510 = vadd.xlane.f32.xlu0 %v2509_v35  ;;  %v2529_v35 = vld [vmem:[%s4649_s15 + $0x8] sm:$0xff] }
 0x6a1   : > { %v2531_v41 = vmul.f32 %v4328_v37, %v2529_v35 }
 0x6a4   : > { %3189 = vadd.xlane.f32.xlu0 %v3188_v50 }
 0x729   : > { %v2511_v50 = vpop.xlane.xlu0 %2510 }
 0x72a   : > { %v2512_v51 = vrot.slane %v2511_v50, 4 }
 0x72c   : > { %v2513_v52 = vadd.f32 %v2512_v51, %v2511_v50  ;;  %v4235_v50 = vld [vmem:[%s4975_s3 + $0x244] ss:$28 sps:$4 sm:$0xff]   ;;  %v4239_v51 = vld [vmem:[%s4975_s3 + $0x1d0] ss:$28 sps:$4 sm:$0xff]  }
 0x72d   : > { %v3190_v0 = vpop.xlane.xlu0 %3189  ;;  %2919 = vmatprep.subr.bf16.mxu0 %v4235_v50 }
 0x72e   : > { %v2514_v56 = vrot.slane %v2513_v52, 2  ;;  %v3191_v26 = vrot.slane %v3190_v0, 4  ;;  %2920 = vmatpush2.bf16.msra.mxu0 %v4233_v49 }
 0x730   : > { %v2515_v55 = vadd.f32 %v2514_v56, %v2513_v52  ;;  %v3192_v27 = vadd.f32 %v3191_v26, %v3190_v0  ;;  %v4241_v52 = vld [vmem:[%s4975_s3 + $0x1d4] ss:$28 sps:$4 sm:$0xff]   ;;  %v4244_v56 = vld [vmem:[%s4975_s3 + $0x328] ss:$28 sps:$4 sm:$0xff]  }
 0x732   : > { %v2516_v43 = vrot.slane %v2515_v55, 1  ;;  %v3193_v28 = vrot.slane %v3192_v27, 2 }
 0x734   : > { %v2517_v61 = vadd.f32 %v2516_v43, %v2515_v55  ;;  %v3194_v29 = vadd.f32 %v3193_v28, %v3192_v27  ;;  %v4245_v55 = vld [vmem:[%s4975_s3 + $0x168] ss:$28 sps:$4 sm:$0xff]   ;;  %v4248_v43 = vld [vmem:[%s4975_s3 + $0x2b8] ss:$28 sps:$4 sm:$0xff]  }
 0x736   : > { %3790 = vpush %v2517_v61  ;;  %v3195_v30 = vrot.slane %v3194_v29, 1  ;;  %v4251_v61 = vld [vmem:[%s4975_s3 + $0xc0] ss:$28 sps:$4 sm:$0xff]  }
 0x738   : > { %v3196_v34 = vadd.f32 %v3195_v30, %v3194_v29 }
 0x767   : > { %s3791_s11 = spop %3790 }
 0x768   : > { %s2521_s12 = smul.f32 0.00048828125, %s3791_s11 }
 0x76a   : > { %v2522_v40 = vstv %s2521_s12 }
 0x76b   : > { %4326 = vrsqrt.f32 %v2522_v40 }
 0x778   : > { %v4327_v33 = vpop.eup %4326 }
 0x779   : > { %3792 = vpush %v4327_v33 }
 0x77a   : > { %3794 = vpush %v3196_v34 }
 0x7aa   : > { %s3793_s13 = spop %3792 }
 0x7ab   : > { %s2525_s18 = smin.f32 %s4407_s14, %s3793_s13  ;;  %s3795_s15 = spop %3794 }
 0x7ac   : > { %v2526_v39 = vstv %s2525_s18  ;;  %v3198_v21 = vstv %s3795_s15 }
 0x7ad   : > { %v2527_v44 = vmul.f32 %v2526_v39, %v4793_v31  ;;  %v2528_v45 = vmul.f32 %v2526_v39, %v4795_v32  ;;  %v4238_v31 = vld [vmem:[%s4975_s3 + $0x20c] ss:$28 sps:$4 sm:$0xff]   ;;  %v3199_v42 = vsub.f32 0.0, %v3198_v21 }
 0x7ae   : > { %v4236_v32 = vld [vmem:[%s4975_s3 + $0x208] ss:$28 sps:$4 sm:$0xff]   ;;  %2921 = vmatprep.subr.bf16.mxu0 %v4238_v31 }
 0x7af   : > { %v2533_v46 = vadd.f32 %v2531_v41, %v2527_v44  ;;  %v2534_v47 = vadd.f32 %v2532_v38, %v2528_v45  ;;  %2922 = vmatpush2.bf16.msra.mxu0 %v4236_v32  ;;  %v3607_v38 = vld [vmem:[%s4977_s5 + $0x13] ss:$0 sm:$0xff] }
 0x7b0   : > { %2923 = vmatprep.subr.bf16.mxu0 %v4241_v52 }
 0x7b1   : > { %v2551_v48 = vpack.c.bf16 %v2534_v47, %v2533_v46  ;;  %v3200_v46 = vmul.f32 0.09016844, %v3199_v42 }
 0x7b3   : > { %2677 = vmatmul.mubr.bf16.vlgmr.msra.gmra.mxu1 %v2551_v48  ;;  %2924 = vmatpush2.bf16.msra.mxu0 %v4239_v51 }
 0x7b4   : > { %3684 = vmatpush3.bf16.msra.mxu1 %v4243_v54 }
 0x7b5   : > { %3685 = vmatprep.subr.bf16.mxu1 %v4244_v56 }
 0x7b8   : > { %3686 = vmatpush3.bf16.msra.mxu1 %v4245_v55 }
 0x7b9   : > { %3687 = vmatprep.subr.bf16.mxu1 %v4246_v57 }
 0x7bc   : > { %3688 = vmatpush3.bf16.msra.mxu1 %v4247_v58 }
 0x7bd   : > { %3689 = vmatprep.subr.bf16.mxu1 %v4248_v43 }
 0x7c0   : > { %3690 = vmatpush3.bf16.msra.mxu1 %v4249_v59 }
 0x7c1   : > { %3691 = vmatprep.subr.bf16.mxu1 %v4250_v60 }
 0x7c4   : > { %3692 = vmatpush3.bf16.msra.mxu1 %v4251_v61 }
 0x7c5   : > { %3693 = vmatprep.subr.bf16.mxu1 %v4252_v13 }
 0x7c8   : > { %3694 = vmatpush3.bf16.msra.mxu1 %v4253_v14 }
 0x7c9   : > { %3695 = vmatprep.subr.bf16.mxu1 %v4254_v15 }
 0x7cc   : > { %3696 = vmatpush3.bf16.msra.mxu1 %v4255_v17 }
 0x7cd   : > { %3697 = vmatprep.subr.bf16.mxu1 %v4256_v19 }
 0x7d0   : > { %3698 = vmatpush3.bf16.msra.mxu1 %v4257_v20 }
 0x873   : > { %v2678_v62 = vpop.f32.mrf.mxu1 }
 0x874   : > { %v2679_v9 = vadd.f32 %v2678_v62, %v2557_v3 }
 0x875   : > { %v2680_v1 = vpop.f32.mrf.mxu1 }
 0x876   : > { %v2681_v7 = vadd.f32 %v2680_v1, %v2561_v2 }
 0x877   : > { %v2682_v4 = vpop.f32.mrf.mxu1 }
 0x878   : > { %v2683_v5 = vadd.f32 %v2682_v4, %v2557_v3 }
 0x879   : > { %v2684_v6 = vpop.f32.mrf.mxu1 }
 0x87a   : > { %v2685_v8 = vadd.f32 %v2684_v6, %v2561_v2  ;;  %v2719_v11 = vpack.c.bf16 %v2683_v5, %v2679_v9 }
 0x87c   : > { %v2720_v10 = vpack.c.bf16 %v2685_v8, %v2681_v7 }
 0x87e   : > { %2925 = vmatprep.mubr.bf16.mxu0 %v2720_v10 }
 0x87f   : > { %2926 = vmatmul.mubr.bf16.vlgmr.msra.gmra.mxu0 %v2719_v11 }
 0x93f   : > { %v2927_v18 = vpop.f32.mrf.mxu0 }
 0x940   : > { %v2928_v40 = vadd.f32 %v2927_v18, %v2726_v12 }
 0x941   : > { %v2929_v0 = vpop.f32.mrf.mxu0 }
 0x942   : > { %v2930_v26 = vadd.f32 %v2929_v0, %v2730_v24  ;;  %v2936_v35 = vmax.f32 %v2928_v40, 0.0 }
 0x943   : > { %v2931_v25 = vpop.f32.mrf.mxu0 }
 0x944   : > { %v2932_v27 = vadd.f32 %v2931_v25, %v2726_v12  ;;  %v2937_v33 = vmax.f32 %v2930_v26, 0.0 }
 0x945   : > { %v2933_v28 = vpop.f32.mrf.mxu0 }
 0x946   : > { %v2934_v29 = vadd.f32 %v2933_v28, %v2730_v24  ;;  %v2938_v30 = vmax.f32 %v2932_v27, 0.0 }
 0x948   : > { %v2939_v34 = vmax.f32 %v2934_v29, 0.0  ;;  %v2972_v37 = vpack.c.bf16 %v2938_v30, %v2936_v35 }
 0x94a   : > { %v2973_v36 = vpack.c.bf16 %v2939_v34, %v2937_v33 }
 0x94c   : > { %3109 = vmatprep.mubr.bf16.mxu1 %v2973_v36 }
 0x94d   : > { %3110 = vmatmul.mubr.bf16.vlgmr.msra.gmra.mxu1 %v2972_v37 }
 0xa0d   : > { %v3699_v41 = vpop.f32.mrf.mxu1 }
 0xa0f   : > { %v3700_v39 = vpop.f32.mrf.mxu1 }
 0xa10   : > { %v3701_v44 = vadd.f32 %v3700_v39, %v3699_v41 }
 0xa11   : > { %v3702_v45 = vpop.f32.mrf.mxu1 }
 0xa12   : > { %v3112_v47 = vadd.f32 %v3701_v44, %v3607_v38 }
 0xa13   : > { %v3703_v48 = vpop.f32.mrf.mxu1 }
 0xa14   : > { %v3204_v49 = vsel %vm3203_vm9, %v3200_v46, %v3112_v47  ;;  %v3704_v50 = vadd.f32 %v3703_v48, %v3702_v45 }
 0xa15   : > { %3206 = vst [vmem:[%s311_s28] sm:$0xff] %v3204_v49 }
 0xa16   : > { %v3115_v16 = vadd.f32 %v3704_v50, %v3607_v38 }
 0xa18   : > { %v3205_v31 = vsel %vm3203_vm9, %v3200_v46, %v3115_v16 }
 0xa19   : > { %3207 = vst [vmem:[%s311_s28 + $0x8] sm:$0xff] %v3205_v31 }
 0xa1a PF: > { %s18_s21 = sadd.s32 1, %s4396_s21  }
 0xa1b   : > { %p15_p3 = scmp.ge.s32.totalorder %s18_s21, 4  }
 0xa1d   :  { %17 = sbr.rel (!%p15_p3) target bundleno = 2 (0x2), region = 86 }
 0xa22   :  { %3230 = vsyncpa [#allocation3], 1 }
 0xa23   :  { %3232 = vsyncpa [#allocation3 + $0x1], 1 }
 0xa24   :  { %3233 = vsyncpa [#allocation5], 1 }

</bundles_post_ra>
